<compile_context>
chip_gen: v7x
topology: tpu7x:2x2x1
jax: 0.10.0
libtpu: 0.0.40
codegen_flags: <defaults>
</compile_context>

<pallas_src>
import math
import functools

import jax
import jax.numpy as jnp
from jax.experimental import pallas as pl
from jax.experimental.pallas import tpu as pltpu


CFG = dict(
    vocab_size=128,
    emb_dim=32,
    n_heads=4,
    n_layers=2,
    max_seq_length=16,
    drop_rate=0.0,
    qkv_bias=False,
)

_VMEM = pl.BlockSpec(memory_space=pltpu.MemorySpace.VMEM)


# ----------------------------------------------------------------------------
# In-kernel helpers (pure f32 elementwise math)
# ----------------------------------------------------------------------------
def _l2_normalize(x):
    # Matches torch: x / ||x||_2 (no epsilon, same as the reference module).
    return x * jax.lax.rsqrt(jnp.sum(x * x, axis=-1, keepdims=True))


def _layernorm(x, scale, shift):
    mean = jnp.mean(x, axis=-1, keepdims=True)
    xc = x - mean
    var = jnp.mean(xc * xc, axis=-1, keepdims=True)  # unbiased=False
    return scale * (xc * jax.lax.rsqrt(var + 1e-5)) + shift


def _gelu_tanh(x):
    c = math.sqrt(2.0 / math.pi)
    return 0.5 * x * (1.0 + jnp.tanh(c * (x + 0.044715 * x * x * x)))


# ----------------------------------------------------------------------------
# Fused forward kernel: one invocation computes the entire model.
# ----------------------------------------------------------------------------
def _ngpt_fused_kernel(
    idx_ref, tok_emb_ref, pos_emb_ref,
    wqkv_ref, wo_ref, bo_ref,
    w_ff1_ref, b_ff1_ref, w_ff2_ref, b_ff2_ref,
    ln1_s_ref, ln1_b_ref, ln2_s_ref, ln2_b_ref,
    fin_s_ref, fin_b_ref,
    w_out_ref, sz_ref,
    out_ref,
    *, B, S, D, H, L, V, sz_scale,
):
    N = B * S
    Dh = D // H
    bf16 = jnp.bfloat16
    f32 = jnp.float32
    att_scale = 1.0 / math.sqrt(Dh)

    # ---- embedding: bf16 one-hot gather (single MXU pass) + l2-norm + pos ----
    idx = idx_ref[...]                                          # (N, 1) int32
    vio = jax.lax.broadcasted_iota(jnp.int32, (N, V), 1)
    one_hot = (idx == vio).astype(bf16)                         # (N, V) bf16
    tok = jnp.dot(one_hot, tok_emb_ref[...],                    # bf16 x bf16
                  preferred_element_type=f32)                   # (N, D) f32
    tok = _l2_normalize(tok)

    pos = _l2_normalize(pos_emb_ref[:S, :].astype(f32))         # (S, D), static slice
    pos_flat = jnp.concatenate([pos] * B, axis=0)               # (N, D), flat layout
    x = tok + pos_flat
    # drop_emb: identity (eval / drop_rate = 0)

    # ---- block-diagonal causal additive mask over the flat N axis (hoisted) ----
    row = jax.lax.broadcasted_iota(jnp.int32, (N, N), 0)
    col = jax.lax.broadcasted_iota(jnp.int32, (N, N), 1)
    bi = jax.lax.broadcasted_iota(jnp.int32, (B, S, B, S), 0).reshape(N, N)
    bj = jax.lax.broadcasted_iota(jnp.int32, (B, S, B, S), 2).reshape(N, N)
    allowed = (bi == bj) & (col <= row)
    mask_add = jnp.where(allowed, jnp.float32(0.0),
                         jnp.float32(-jnp.inf))                 # (N, N)

    for li in range(L):
        # ---- attention sub-block (pre-LN), heads batched ----
        shortcut = x
        h = _layernorm(x, ln1_s_ref[li], ln1_b_ref[li])
        qkv = jnp.dot(h.astype(bf16), wqkv_ref[li],             # fused QKV matmul
                      preferred_element_type=f32)               # (N, 3D) f32

        # one head-major relayout instead of 3*H lane slices:
        qkv_h = jnp.transpose(qkv.astype(bf16).reshape(N, 3 * H, Dh),
                              (1, 0, 2))                        # (3H, N, Dh) bf16
        q = qkv_h[0:H]                                          # (H, N, Dh)
        k = qkv_h[H:2 * H]
        v = qkv_h[2 * H:3 * H]

        s = jnp.einsum("hqd,hkd->hqk", q, k,
                       preferred_element_type=f32)              # (H, N, N) f32
        s = s * att_scale + mask_add[None]
        m = jnp.max(s, axis=-1, keepdims=True)
        p = jnp.exp(s - m)
        p = p / jnp.sum(p, axis=-1, keepdims=True)              # exact softmax (f32)
        ctx_h = jnp.einsum("hqk,hkd->hqd", p.astype(bf16), v,
                           preferred_element_type=f32)          # (H, N, Dh) f32
        ctx = jnp.transpose(ctx_h, (1, 0, 2)).reshape(N, D)     # head-concat order

        attn_out = jnp.dot(ctx.astype(bf16), wo_ref[li],
                           preferred_element_type=f32) + bo_ref[li]
        x = shortcut + attn_out

        # ---- feed-forward sub-block (pre-LN) ----
        shortcut = x
        h = _layernorm(x, ln2_s_ref[li], ln2_b_ref[li])
        ff = jnp.dot(h.astype(bf16), w_ff1_ref[li],
                     preferred_element_type=f32) + b_ff1_ref[li]
        ff = _gelu_tanh(ff)                                     # f32 elementwise
        ff = jnp.dot(ff.astype(bf16), w_ff2_ref[li],
                     preferred_element_type=f32) + b_ff2_ref[li]
        x = shortcut + ff

    # ---- final norm + scaled output head: logits = sz * (x @ W_out) ----
    x = _layernorm(x, fin_s_ref[...], fin_b_ref[...])
    logits = jnp.dot(x.astype(bf16), w_out_ref[...],
                     preferred_element_type=f32)                # (N, V) lane-dense
    out_ref[...] = (sz_ref[...] * sz_scale) * logits


# ----------------------------------------------------------------------------
# Parameter initialization: matmul weights stored in bf16 ONCE here, so the
# per-call forward never emits convert/slice HLOs.
# ----------------------------------------------------------------------------
def init_params(cfg, key):
    V, D = cfg["vocab_size"], cfg["emb_dim"]
    H, L, M = cfg["n_heads"], cfg["n_layers"], cfg["max_seq_length"]
    assert D % H == 0
    bf16 = jnp.bfloat16

    def nrm(k, shape, dtype, scale=0.02):
        return (scale * jax.random.normal(k, shape)).astype(dtype)

    ks = jax.random.split(key, 8)
    return dict(
        tok_emb=nrm(ks[0], (V, D), bf16),
        pos_emb=nrm(ks[1], (M, D), jnp.float32),
        out_head_w=nrm(ks[2], (D, V), bf16),                 # stored (Din, Dout)
        final_scale=jnp.ones((1, D), jnp.float32),
        final_shift=jnp.zeros((1, D), jnp.float32),
        # sz init: ones * sz_init_scaling (as in reset_parameters)
        sz=jnp.ones((1, V), jnp.float32) * (1.0 / math.sqrt(D)),
        # per-layer params stacked on a leading L axis; QKV fused on output dim
        # with column order (qkv_type, head, head_dim):
        wqkv=nrm(ks[3], (L, D, 3 * D), bf16),
        wo=nrm(ks[4], (L, D, D), bf16),
        bo=jnp.zeros((L, 1, D), jnp.float32),
        w_ff1=nrm(ks[5], (L, D, 4 * D), bf16),
        b_ff1=jnp.zeros((L, 1, 4 * D), jnp.float32),
        w_ff2=nrm(ks[6], (L, 4 * D, D), bf16),
        b_ff2=jnp.zeros((L, 1, D), jnp.float32),
        ln1_scale=jnp.ones((L, 1, D), jnp.float32),
        ln1_shift=jnp.zeros((L, 1, D), jnp.float32),
        ln2_scale=jnp.ones((L, 1, D), jnp.float32),
        ln2_shift=jnp.zeros((L, 1, D), jnp.float32),
    )


# ----------------------------------------------------------------------------
# Forward pass: single grid-less pallas_call, all params VMEM-resident.
# ----------------------------------------------------------------------------
def ngpt_forward(params, in_idx, cfg):
    B, S = in_idx.shape
    D, H = cfg["emb_dim"], cfg["n_heads"]
    L, V = cfg["n_layers"], cfg["vocab_size"]
    assert S <= cfg["max_seq_length"]
    N = B * S

    idx2d = in_idx.reshape(N, 1).astype(jnp.int32)

    sz_init_value = 1.0
    sz_init_scaling = 1.0 / math.sqrt(D)
    sz_scale = float(sz_init_value / sz_init_scaling)

    kernel = functools.partial(
        _ngpt_fused_kernel,
        B=B, S=S, D=D, H=H, L=L, V=V, sz_scale=sz_scale)

    logits = pl.pallas_call(
        kernel,
        out_shape=jax.ShapeDtypeStruct((N, V), jnp.float32),
        in_specs=[_VMEM] * 18,
        out_specs=_VMEM,
    )(
        idx2d,
        params["tok_emb"], params["pos_emb"],
        params["wqkv"], params["wo"], params["bo"],
        params["w_ff1"], params["b_ff1"],
        params["w_ff2"], params["b_ff2"],
        params["ln1_scale"], params["ln1_shift"],
        params["ln2_scale"], params["ln2_shift"],
        params["final_scale"], params["final_shift"],
        params["out_head_w"], params["sz"],
    )
    return logits.reshape(B, S, V)


if __name__ == "__main__":
    key = jax.random.PRNGKey(0)
    pkey, ikey = jax.random.split(key)
    params = init_params(CFG, pkey)

    B, S = 2, 8
    in_idx = jax.random.randint(ikey, (B, S), 0, CFG["vocab_size"],
                                dtype=jnp.int32)

    fwd = jax.jit(functools.partial(ngpt_forward, cfg=CFG))
    logits = fwd(params, in_idx)
    jax.block_until_ready(logits)
    assert logits.shape == (B, S, CFG["vocab_size"])
    assert bool(jnp.all(jnp.isfinite(logits)))
    print("KERNEL_OK")
</pallas_src>

<mosaic_0001>
module attributes {stable_mosaic.version = 11 : i64} {
  func.func @_ngpt_fused_kernel(%arg0: memref<16x1xi32, #tpu.memory_space<vmem>>, %arg1: memref<128x32xbf16, #tpu.memory_space<vmem>>, %arg2: memref<16x32xf32, #tpu.memory_space<vmem>>, %arg3: memref<2x32x96xbf16, #tpu.memory_space<vmem>>, %arg4: memref<2x32x32xbf16, #tpu.memory_space<vmem>>, %arg5: memref<2x1x32xf32, #tpu.memory_space<vmem>>, %arg6: memref<2x32x128xbf16, #tpu.memory_space<vmem>>, %arg7: memref<2x1x128xf32, #tpu.memory_space<vmem>>, %arg8: memref<2x128x32xbf16, #tpu.memory_space<vmem>>, %arg9: memref<2x1x32xf32, #tpu.memory_space<vmem>>, %arg10: memref<2x1x32xf32, #tpu.memory_space<vmem>>, %arg11: memref<2x1x32xf32, #tpu.memory_space<vmem>>, %arg12: memref<2x1x32xf32, #tpu.memory_space<vmem>>, %arg13: memref<2x1x32xf32, #tpu.memory_space<vmem>>, %arg14: memref<1x32xf32, #tpu.memory_space<vmem>>, %arg15: memref<1x32xf32, #tpu.memory_space<vmem>>, %arg16: memref<32x128xbf16, #tpu.memory_space<vmem>>, %arg17: memref<1x128xf32, #tpu.memory_space<vmem>>, %arg18: memref<16x128xf32, #tpu.memory_space<vmem>>) attributes {dimension_semantics = [], scalar_prefetch = 0 : i64, scratch_operands = 0 : i64, tpu.core_type = #tpu.core_type<tc>} {
    %c0 = arith.constant 0 : index
    %c0_0 = arith.constant 0 : index
    %0 = vector.load %arg0[%c0, %c0_0] : memref<16x1xi32, #tpu.memory_space<vmem>>, vector<16x1xi32>
    %1 = tpu.iota {dimensions = array<i32: 1>} : vector<16x128xi32>
    %2 = vector.broadcast %0 : vector<16x1xi32> to vector<16x128xi32>
    %3 = arith.cmpi eq, %2, %1 : vector<16x128xi32>
    %4 = arith.extui %3 : vector<16x128xi1> to vector<16x128xi32>
    %5 = arith.sitofp %4 : vector<16x128xi32> to vector<16x128xf32>
    %6 = arith.truncf %5 : vector<16x128xf32> to vector<16x128xbf16>
    %c0_1 = arith.constant 0 : index
    %c0_2 = arith.constant 0 : index
    %7 = vector.load %arg1[%c0_1, %c0_2] : memref<128x32xbf16, #tpu.memory_space<vmem>>, vector<128x32xbf16>
    %cst = arith.constant dense<0.000000e+00> : vector<16x32xf32>
    %8 = tpu.matmul %6, %7, %cst {dimension_numbers = #tpu.dot_dimension_numbers<[1], [0], [0], [1], [0, 0, 1, 1], [], []>} : vector<16x128xbf16>, vector<128x32xbf16>, vector<16x32xf32> -> vector<16x32xf32>
    %9 = arith.mulf %8, %8 : vector<16x32xf32>
    %cst_3 = arith.constant dense<0.000000e+00> : vector<16xf32>
    %10 = vector.multi_reduction <add>, %9, %cst_3 [1] : vector<16x32xf32> to vector<16xf32>
    %11 = vector.shape_cast %10 : vector<16xf32> to vector<16x1xf32>
    %12 = math.rsqrt %11 : vector<16x1xf32>
    %13 = vector.broadcast %12 : vector<16x1xf32> to vector<16x32xf32>
    %14 = arith.mulf %8, %13 : vector<16x32xf32>
    %c0_4 = arith.constant 0 : index
    %c0_5 = arith.constant 0 : index
    %15 = vector.load %arg2[%c0_4, %c0_5] : memref<16x32xf32, #tpu.memory_space<vmem>>, vector<8x32xf32>
    %16 = arith.mulf %15, %15 : vector<8x32xf32>
    %cst_6 = arith.constant dense<0.000000e+00> : vector<8xf32>
    %17 = vector.multi_reduction <add>, %16, %cst_6 [1] : vector<8x32xf32> to vector<8xf32>
    %18 = vector.shape_cast %17 : vector<8xf32> to vector<8x1xf32>
    %19 = math.rsqrt %18 : vector<8x1xf32>
    %20 = vector.broadcast %19 : vector<8x1xf32> to vector<8x32xf32>
    %21 = arith.mulf %15, %20 : vector<8x32xf32>
    %22 = tpu.concatenate %21, %21 in 0 : vector<8x32xf32>, vector<8x32xf32> -> vector<16x32xf32>
    %23 = arith.addf %14, %22 : vector<16x32xf32>
    %24 = tpu.iota {dimensions = array<i32: 0>} : vector<16x16xi32>
    %25 = tpu.iota {dimensions = array<i32: 1>} : vector<16x16xi32>
    %26 = tpu.iota {dimensions = array<i32: 0>} : vector<2x8x2x8xi32>
    %27 = vector.shape_cast %26 : vector<2x8x2x8xi32> to vector<16x16xi32>
    %28 = tpu.iota {dimensions = array<i32: 2>} : vector<2x8x2x8xi32>
    %29 = vector.shape_cast %28 : vector<2x8x2x8xi32> to vector<16x16xi32>
    %30 = arith.cmpi eq, %27, %29 : vector<16x16xi32>
    %31 = arith.cmpi sle, %25, %24 : vector<16x16xi32>
    %32 = arith.andi %30, %31 : vector<16x16xi1>
    %cst_7 = arith.constant 0.000000e+00 : f32
    %cst_8 = arith.constant 0xFF800000 : f32
    %33 = vector.broadcast %cst_7 : f32 to vector<16x16xf32>
    %34 = vector.broadcast %cst_8 : f32 to vector<16x16xf32>
    %35 = arith.select %32, %33, %34 : vector<16x16xi1>, vector<16x16xf32>
    %c0_9 = arith.constant 0 : index
    %c0_10 = arith.constant 0 : index
    %c0_11 = arith.constant 0 : index
    %36 = vector.load %arg10[%c0_9, %c0_10, %c0_11] : memref<2x1x32xf32, #tpu.memory_space<vmem>>, vector<1x1x32xf32>
    %37 = vector.shape_cast %36 : vector<1x1x32xf32> to vector<1x32xf32>
    %c0_12 = arith.constant 0 : index
    %c0_13 = arith.constant 0 : index
    %c0_14 = arith.constant 0 : index
    %38 = vector.load %arg11[%c0_12, %c0_13, %c0_14] : memref<2x1x32xf32, #tpu.memory_space<vmem>>, vector<1x1x32xf32>
    %39 = vector.shape_cast %38 : vector<1x1x32xf32> to vector<1x32xf32>
    %cst_15 = arith.constant dense<0.000000e+00> : vector<16xf32>
    %40 = vector.multi_reduction <add>, %23, %cst_15 [1] : vector<16x32xf32> to vector<16xf32>
    %41 = vector.shape_cast %40 : vector<16xf32> to vector<16x1xf32>
    %cst_16 = arith.constant 3.200000e+01 : f32
    %42 = vector.broadcast %cst_16 : f32 to vector<16x1xf32>
    %43 = arith.divf %41, %42 : vector<16x1xf32>
    %44 = vector.broadcast %43 : vector<16x1xf32> to vector<16x32xf32>
    %45 = arith.subf %23, %44 : vector<16x32xf32>
    %46 = arith.mulf %45, %45 : vector<16x32xf32>
    %cst_17 = arith.constant dense<0.000000e+00> : vector<16xf32>
    %47 = vector.multi_reduction <add>, %46, %cst_17 [1] : vector<16x32xf32> to vector<16xf32>
    %48 = vector.shape_cast %47 : vector<16xf32> to vector<16x1xf32>
    %cst_18 = arith.constant 3.200000e+01 : f32
    %49 = vector.broadcast %cst_18 : f32 to vector<16x1xf32>
    %50 = arith.divf %48, %49 : vector<16x1xf32>
    %cst_19 = arith.constant 9.99999974E-6 : f32
    %51 = vector.broadcast %cst_19 : f32 to vector<16x1xf32>
    %52 = arith.addf %50, %51 : vector<16x1xf32>
    %53 = math.rsqrt %52 : vector<16x1xf32>
    %54 = vector.broadcast %53 : vector<16x1xf32> to vector<16x32xf32>
    %55 = arith.mulf %45, %54 : vector<16x32xf32>
    %56 = vector.broadcast %37 : vector<1x32xf32> to vector<16x32xf32>
    %57 = arith.mulf %56, %55 : vector<16x32xf32>
    %58 = vector.broadcast %39 : vector<1x32xf32> to vector<16x32xf32>
    %59 = arith.addf %57, %58 : vector<16x32xf32>
    %60 = arith.truncf %59 : vector<16x32xf32> to vector<16x32xbf16>
    %c0_20 = arith.constant 0 : index
    %c0_21 = arith.constant 0 : index
    %c0_22 = arith.constant 0 : index
    %61 = vector.load %arg3[%c0_20, %c0_21, %c0_22] : memref<2x32x96xbf16, #tpu.memory_space<vmem>>, vector<1x32x96xbf16>
    %62 = vector.shape_cast %61 : vector<1x32x96xbf16> to vector<32x96xbf16>
    %cst_23 = arith.constant dense<0.000000e+00> : vector<16x96xf32>
    %63 = tpu.matmul %60, %62, %cst_23 {dimension_numbers = #tpu.dot_dimension_numbers<[1], [0], [0], [1], [0, 0, 1, 1], [], []>} : vector<16x32xbf16>, vector<32x96xbf16>, vector<16x96xf32> -> vector<16x96xf32>
    %64 = arith.truncf %63 : vector<16x96xf32> to vector<16x96xbf16>
    %65 = vector.shape_cast %64 : vector<16x96xbf16> to vector<16x12x8xbf16>
    %66 = tpu.transpose %65, [1, 0, 2] : vector<16x12x8xbf16> -> vector<12x16x8xbf16>
    %67 = vector.extract_strided_slice %66 {offsets = [0, 0, 0], sizes = [4, 16, 8], strides = [1, 1, 1]} : vector<12x16x8xbf16> to vector<4x16x8xbf16>
    %68 = vector.extract_strided_slice %66 {offsets = [4, 0, 0], sizes = [4, 16, 8], strides = [1, 1, 1]} : vector<12x16x8xbf16> to vector<4x16x8xbf16>
    %69 = vector.extract_strided_slice %66 {offsets = [8, 0, 0], sizes = [4, 16, 8], strides = [1, 1, 1]} : vector<12x16x8xbf16> to vector<4x16x8xbf16>
    "tpu.trace_start"() <{level = 10 : i32, message = "hqd,hkd->hqk"}> : () -> ()
    %cst_24 = arith.constant dense<0.000000e+00> : vector<4x16x16xf32>
    %70 = tpu.matmul %67, %68, %cst_24 {dimension_numbers = #tpu.dot_dimension_numbers<[2], [2], [1], [1], [0, 0, 0, 1, 1, 1], [0], [0]>} : vector<4x16x8xbf16>, vector<4x16x8xbf16>, vector<4x16x16xf32> -> vector<4x16x16xf32>
    "tpu.trace_stop"() : () -> ()
    %cst_25 = arith.constant 0.353553385 : f32
    %71 = vector.broadcast %cst_25 : f32 to vector<4x16x16xf32>
    %72 = arith.mulf %70, %71 : vector<4x16x16xf32>
    %73 = vector.shape_cast %35 : vector<16x16xf32> to vector<1x16x16xf32>
    %74 = vector.broadcast %73 : vector<1x16x16xf32> to vector<4x16x16xf32>
    %75 = arith.addf %72, %74 : vector<4x16x16xf32>
    %cst_26 = arith.constant dense<0xFF800000> : vector<4x16xf32>
    %76 = vector.multi_reduction <maximumf>, %75, %cst_26 [2] : vector<4x16x16xf32> to vector<4x16xf32>
    %77 = vector.shape_cast %76 : vector<4x16xf32> to vector<4x16x1xf32>
    %78 = vector.broadcast %77 : vector<4x16x1xf32> to vector<4x16x16xf32>
    %79 = arith.subf %75, %78 : vector<4x16x16xf32>
    %80 = math.exp %79 : vector<4x16x16xf32>
    %cst_27 = arith.constant dense<0.000000e+00> : vector<4x16xf32>
    %81 = vector.multi_reduction <add>, %80, %cst_27 [2] : vector<4x16x16xf32> to vector<4x16xf32>
    %82 = vector.shape_cast %81 : vector<4x16xf32> to vector<4x16x1xf32>
    %83 = vector.broadcast %82 : vector<4x16x1xf32> to vector<4x16x16xf32>
    %84 = arith.divf %80, %83 : vector<4x16x16xf32>
    %85 = arith.truncf %84 : vector<4x16x16xf32> to vector<4x16x16xbf16>
    "tpu.trace_start"() <{level = 10 : i32, message = "hqk,hkd->hqd"}> : () -> ()
    %cst_28 = arith.constant dense<0.000000e+00> : vector<4x16x8xf32>
    %86 = tpu.matmul %85, %69, %cst_28 {dimension_numbers = #tpu.dot_dimension_numbers<[2], [1], [1], [2], [0, 0, 0, 1, 1, 2], [0], [0]>} : vector<4x16x16xbf16>, vector<4x16x8xbf16>, vector<4x16x8xf32> -> vector<4x16x8xf32>
    "tpu.trace_stop"() : () -> ()
    %87 = tpu.transpose %86, [1, 0, 2] : vector<4x16x8xf32> -> vector<16x4x8xf32>
    %88 = vector.shape_cast %87 : vector<16x4x8xf32> to vector<16x32xf32>
    %89 = arith.truncf %88 : vector<16x32xf32> to vector<16x32xbf16>
    %c0_29 = arith.constant 0 : index
    %c0_30 = arith.constant 0 : index
    %c0_31 = arith.constant 0 : index
    %90 = vector.load %arg4[%c0_29, %c0_30, %c0_31] : memref<2x32x32xbf16, #tpu.memory_space<vmem>>, vector<1x32x32xbf16>
    %91 = vector.shape_cast %90 : vector<1x32x32xbf16> to vector<32x32xbf16>
    %cst_32 = arith.constant dense<0.000000e+00> : vector<16x32xf32>
    %92 = tpu.matmul %89, %91, %cst_32 {dimension_numbers = #tpu.dot_dimension_numbers<[1], [0], [0], [1], [0, 0, 1, 1], [], []>} : vector<16x32xbf16>, vector<32x32xbf16>, vector<16x32xf32> -> vector<16x32xf32>
    %c0_33 = arith.constant 0 : index
    %c0_34 = arith.constant 0 : index
    %c0_35 = arith.constant 0 : index
    %93 = vector.load %arg5[%c0_33, %c0_34, %c0_35] : memref<2x1x32xf32, #tpu.memory_space<vmem>>, vector<1x1x32xf32>
    %94 = vector.shape_cast %93 : vector<1x1x32xf32> to vector<1x32xf32>
    %95 = vector.broadcast %94 : vector<1x32xf32> to vector<16x32xf32>
    %96 = arith.addf %92, %95 : vector<16x32xf32>
    %97 = arith.addf %23, %96 : vector<16x32xf32>
    %c0_36 = arith.constant 0 : index
    %c0_37 = arith.constant 0 : index
    %c0_38 = arith.constant 0 : index
    %98 = vector.load %arg12[%c0_36, %c0_37, %c0_38] : memref<2x1x32xf32, #tpu.memory_space<vmem>>, vector<1x1x32xf32>
    %99 = vector.shape_cast %98 : vector<1x1x32xf32> to vector<1x32xf32>
    %c0_39 = arith.constant 0 : index
    %c0_40 = arith.constant 0 : index
    %c0_41 = arith.constant 0 : index
    %100 = vector.load %arg13[%c0_39, %c0_40, %c0_41] : memref<2x1x32xf32, #tpu.memory_space<vmem>>, vector<1x1x32xf32>
    %101 = vector.shape_cast %100 : vector<1x1x32xf32> to vector<1x32xf32>
    %cst_42 = arith.constant dense<0.000000e+00> : vector<16xf32>
    %102 = vector.multi_reduction <add>, %97, %cst_42 [1] : vector<16x32xf32> to vector<16xf32>
    %103 = vector.shape_cast %102 : vector<16xf32> to vector<16x1xf32>
    %cst_43 = arith.constant 3.200000e+01 : f32
    %104 = vector.broadcast %cst_43 : f32 to vector<16x1xf32>
    %105 = arith.divf %103, %104 : vector<16x1xf32>
    %106 = vector.broadcast %105 : vector<16x1xf32> to vector<16x32xf32>
    %107 = arith.subf %97, %106 : vector<16x32xf32>
    %108 = arith.mulf %107, %107 : vector<16x32xf32>
    %cst_44 = arith.constant dense<0.000000e+00> : vector<16xf32>
    %109 = vector.multi_reduction <add>, %108, %cst_44 [1] : vector<16x32xf32> to vector<16xf32>
    %110 = vector.shape_cast %109 : vector<16xf32> to vector<16x1xf32>
    %cst_45 = arith.constant 3.200000e+01 : f32
    %111 = vector.broadcast %cst_45 : f32 to vector<16x1xf32>
    %112 = arith.divf %110, %111 : vector<16x1xf32>
    %cst_46 = arith.constant 9.99999974E-6 : f32
    %113 = vector.broadcast %cst_46 : f32 to vector<16x1xf32>
    %114 = arith.addf %112, %113 : vector<16x1xf32>
    %115 = math.rsqrt %114 : vector<16x1xf32>
    %116 = vector.broadcast %115 : vector<16x1xf32> to vector<16x32xf32>
    %117 = arith.mulf %107, %116 : vector<16x32xf32>
    %118 = vector.broadcast %99 : vector<1x32xf32> to vector<16x32xf32>
    %119 = arith.mulf %118, %117 : vector<16x32xf32>
    %120 = vector.broadcast %101 : vector<1x32xf32> to vector<16x32xf32>
    %121 = arith.addf %119, %120 : vector<16x32xf32>
    %122 = arith.truncf %121 : vector<16x32xf32> to vector<16x32xbf16>
    %c0_47 = arith.constant 0 : index
    %c0_48 = arith.constant 0 : index
    %c0_49 = arith.constant 0 : index
    %123 = vector.load %arg6[%c0_47, %c0_48, %c0_49] : memref<2x32x128xbf16, #tpu.memory_space<vmem>>, vector<1x32x128xbf16>
    %124 = vector.shape_cast %123 : vector<1x32x128xbf16> to vector<32x128xbf16>
    %cst_50 = arith.constant dense<0.000000e+00> : vector<16x128xf32>
    %125 = tpu.matmul %122, %124, %cst_50 {dimension_numbers = #tpu.dot_dimension_numbers<[1], [0], [0], [1], [0, 0, 1, 1], [], []>} : vector<16x32xbf16>, vector<32x128xbf16>, vector<16x128xf32> -> vector<16x128xf32>
    %c0_51 = arith.constant 0 : index
    %c0_52 = arith.constant 0 : index
    %c0_53 = arith.constant 0 : index
    %126 = vector.load %arg7[%c0_51, %c0_52, %c0_53] : memref<2x1x128xf32, #tpu.memory_space<vmem>>, vector<1x1x128xf32>
    %127 = vector.shape_cast %126 : vector<1x1x128xf32> to vector<1x128xf32>
    %128 = vector.broadcast %127 : vector<1x128xf32> to vector<16x128xf32>
    %129 = arith.addf %125, %128 : vector<16x128xf32>
    %cst_54 = arith.constant 5.000000e-01 : f32
    %130 = vector.broadcast %cst_54 : f32 to vector<16x128xf32>
    %131 = arith.mulf %130, %129 : vector<16x128xf32>
    %cst_55 = arith.constant 4.471500e-02 : f32
    %132 = vector.broadcast %cst_55 : f32 to vector<16x128xf32>
    %133 = arith.mulf %132, %129 : vector<16x128xf32>
    %134 = arith.mulf %133, %129 : vector<16x128xf32>
    %135 = arith.mulf %134, %129 : vector<16x128xf32>
    %136 = arith.addf %129, %135 : vector<16x128xf32>
    %cst_56 = arith.constant 0.797884583 : f32
    %137 = vector.broadcast %cst_56 : f32 to vector<16x128xf32>
    %138 = arith.mulf %137, %136 : vector<16x128xf32>
    %139 = math.tanh %138 : vector<16x128xf32>
    %cst_57 = arith.constant 1.000000e+00 : f32
    %140 = vector.broadcast %cst_57 : f32 to vector<16x128xf32>
    %141 = arith.addf %140, %139 : vector<16x128xf32>
    %142 = arith.mulf %131, %141 : vector<16x128xf32>
    %143 = arith.truncf %142 : vector<16x128xf32> to vector<16x128xbf16>
    %c0_58 = arith.constant 0 : index
    %c0_59 = arith.constant 0 : index
    %c0_60 = arith.constant 0 : index
    %144 = vector.load %arg8[%c0_58, %c0_59, %c0_60] : memref<2x128x32xbf16, #tpu.memory_space<vmem>>, vector<1x128x32xbf16>
    %145 = vector.shape_cast %144 : vector<1x128x32xbf16> to vector<128x32xbf16>
    %cst_61 = arith.constant dense<0.000000e+00> : vector<16x32xf32>
    %146 = tpu.matmul %143, %145, %cst_61 {dimension_numbers = #tpu.dot_dimension_numbers<[1], [0], [0], [1], [0, 0, 1, 1], [], []>} : vector<16x128xbf16>, vector<128x32xbf16>, vector<16x32xf32> -> vector<16x32xf32>
    %c0_62 = arith.constant 0 : index
    %c0_63 = arith.constant 0 : index
    %c0_64 = arith.constant 0 : index
    %147 = vector.load %arg9[%c0_62, %c0_63, %c0_64] : memref<2x1x32xf32, #tpu.memory_space<vmem>>, vector<1x1x32xf32>
    %148 = vector.shape_cast %147 : vector<1x1x32xf32> to vector<1x32xf32>
    %149 = vector.broadcast %148 : vector<1x32xf32> to vector<16x32xf32>
    %150 = arith.addf %146, %149 : vector<16x32xf32>
    %151 = arith.addf %97, %150 : vector<16x32xf32>
    %c1 = arith.constant 1 : index
    %c0_65 = arith.constant 0 : index
    %c0_66 = arith.constant 0 : index
    %152 = vector.load %arg10[%c1, %c0_65, %c0_66] : memref<2x1x32xf32, #tpu.memory_space<vmem>>, vector<1x1x32xf32>
    %153 = vector.shape_cast %152 : vector<1x1x32xf32> to vector<1x32xf32>
    %c1_67 = arith.constant 1 : index
    %c0_68 = arith.constant 0 : index
    %c0_69 = arith.constant 0 : index
    %154 = vector.load %arg11[%c1_67, %c0_68, %c0_69] : memref<2x1x32xf32, #tpu.memory_space<vmem>>, vector<1x1x32xf32>
    %155 = vector.shape_cast %154 : vector<1x1x32xf32> to vector<1x32xf32>
    %cst_70 = arith.constant dense<0.000000e+00> : vector<16xf32>
    %156 = vector.multi_reduction <add>, %151, %cst_70 [1] : vector<16x32xf32> to vector<16xf32>
    %157 = vector.shape_cast %156 : vector<16xf32> to vector<16x1xf32>
    %cst_71 = arith.constant 3.200000e+01 : f32
    %158 = vector.broadcast %cst_71 : f32 to vector<16x1xf32>
    %159 = arith.divf %157, %158 : vector<16x1xf32>
    %160 = vector.broadcast %159 : vector<16x1xf32> to vector<16x32xf32>
    %161 = arith.subf %151, %160 : vector<16x32xf32>
    %162 = arith.mulf %161, %161 : vector<16x32xf32>
    %cst_72 = arith.constant dense<0.000000e+00> : vector<16xf32>
    %163 = vector.multi_reduction <add>, %162, %cst_72 [1] : vector<16x32xf32> to vector<16xf32>
    %164 = vector.shape_cast %163 : vector<16xf32> to vector<16x1xf32>
    %cst_73 = arith.constant 3.200000e+01 : f32
    %165 = vector.broadcast %cst_73 : f32 to vector<16x1xf32>
    %166 = arith.divf %164, %165 : vector<16x1xf32>
    %cst_74 = arith.constant 9.99999974E-6 : f32
    %167 = vector.broadcast %cst_74 : f32 to vector<16x1xf32>
    %168 = arith.addf %166, %167 : vector<16x1xf32>
    %169 = math.rsqrt %168 : vector<16x1xf32>
    %170 = vector.broadcast %169 : vector<16x1xf32> to vector<16x32xf32>
    %171 = arith.mulf %161, %170 : vector<16x32xf32>
    %172 = vector.broadcast %153 : vector<1x32xf32> to vector<16x32xf32>
    %173 = arith.mulf %172, %171 : vector<16x32xf32>
    %174 = vector.broadcast %155 : vector<1x32xf32> to vector<16x32xf32>
    %175 = arith.addf %173, %174 : vector<16x32xf32>
    %176 = arith.truncf %175 : vector<16x32xf32> to vector<16x32xbf16>
    %c1_75 = arith.constant 1 : index
    %c0_76 = arith.constant 0 : index
    %c0_77 = arith.constant 0 : index
    %177 = vector.load %arg3[%c1_75, %c0_76, %c0_77] : memref<2x32x96xbf16, #tpu.memory_space<vmem>>, vector<1x32x96xbf16>
    %178 = vector.shape_cast %177 : vector<1x32x96xbf16> to vector<32x96xbf16>
    %cst_78 = arith.constant dense<0.000000e+00> : vector<16x96xf32>
    %179 = tpu.matmul %176, %178, %cst_78 {dimension_numbers = #tpu.dot_dimension_numbers<[1], [0], [0], [1], [0, 0, 1, 1], [], []>} : vector<16x32xbf16>, vector<32x96xbf16>, vector<16x96xf32> -> vector<16x96xf32>
    %180 = arith.truncf %179 : vector<16x96xf32> to vector<16x96xbf16>
    %181 = vector.shape_cast %180 : vector<16x96xbf16> to vector<16x12x8xbf16>
    %182 = tpu.transpose %181, [1, 0, 2] : vector<16x12x8xbf16> -> vector<12x16x8xbf16>
    %183 = vector.extract_strided_slice %182 {offsets = [0, 0, 0], sizes = [4, 16, 8], strides = [1, 1, 1]} : vector<12x16x8xbf16> to vector<4x16x8xbf16>
    %184 = vector.extract_strided_slice %182 {offsets = [4, 0, 0], sizes = [4, 16, 8], strides = [1, 1, 1]} : vector<12x16x8xbf16> to vector<4x16x8xbf16>
    %185 = vector.extract_strided_slice %182 {offsets = [8, 0, 0], sizes = [4, 16, 8], strides = [1, 1, 1]} : vector<12x16x8xbf16> to vector<4x16x8xbf16>
    "tpu.trace_start"() <{level = 10 : i32, message = "hqd,hkd->hqk"}> : () -> ()
    %cst_79 = arith.constant dense<0.000000e+00> : vector<4x16x16xf32>
    %186 = tpu.matmul %183, %184, %cst_79 {dimension_numbers = #tpu.dot_dimension_numbers<[2], [2], [1], [1], [0, 0, 0, 1, 1, 1], [0], [0]>} : vector<4x16x8xbf16>, vector<4x16x8xbf16>, vector<4x16x16xf32> -> vector<4x16x16xf32>
    "tpu.trace_stop"() : () -> ()
    %cst_80 = arith.constant 0.353553385 : f32
    %187 = vector.broadcast %cst_80 : f32 to vector<4x16x16xf32>
    %188 = arith.mulf %186, %187 : vector<4x16x16xf32>
    %189 = vector.shape_cast %35 : vector<16x16xf32> to vector<1x16x16xf32>
    %190 = vector.broadcast %189 : vector<1x16x16xf32> to vector<4x16x16xf32>
    %191 = arith.addf %188, %190 : vector<4x16x16xf32>
    %cst_81 = arith.constant dense<0xFF800000> : vector<4x16xf32>
    %192 = vector.multi_reduction <maximumf>, %191, %cst_81 [2] : vector<4x16x16xf32> to vector<4x16xf32>
    %193 = vector.shape_cast %192 : vector<4x16xf32> to vector<4x16x1xf32>
    %194 = vector.broadcast %193 : vector<4x16x1xf32> to vector<4x16x16xf32>
    %195 = arith.subf %191, %194 : vector<4x16x16xf32>
    %196 = math.exp %195 : vector<4x16x16xf32>
    %cst_82 = arith.constant dense<0.000000e+00> : vector<4x16xf32>
    %197 = vector.multi_reduction <add>, %196, %cst_82 [2] : vector<4x16x16xf32> to vector<4x16xf32>
    %198 = vector.shape_cast %197 : vector<4x16xf32> to vector<4x16x1xf32>
    %199 = vector.broadcast %198 : vector<4x16x1xf32> to vector<4x16x16xf32>
    %200 = arith.divf %196, %199 : vector<4x16x16xf32>
    %201 = arith.truncf %200 : vector<4x16x16xf32> to vector<4x16x16xbf16>
    "tpu.trace_start"() <{level = 10 : i32, message = "hqk,hkd->hqd"}> : () -> ()
    %cst_83 = arith.constant dense<0.000000e+00> : vector<4x16x8xf32>
    %202 = tpu.matmul %201, %185, %cst_83 {dimension_numbers = #tpu.dot_dimension_numbers<[2], [1], [1], [2], [0, 0, 0, 1, 1, 2], [0], [0]>} : vector<4x16x16xbf16>, vector<4x16x8xbf16>, vector<4x16x8xf32> -> vector<4x16x8xf32>
    "tpu.trace_stop"() : () -> ()
    %203 = tpu.transpose %202, [1, 0, 2] : vector<4x16x8xf32> -> vector<16x4x8xf32>
    %204 = vector.shape_cast %203 : vector<16x4x8xf32> to vector<16x32xf32>
    %205 = arith.truncf %204 : vector<16x32xf32> to vector<16x32xbf16>
    %c1_84 = arith.constant 1 : index
    %c0_85 = arith.constant 0 : index
    %c0_86 = arith.constant 0 : index
    %206 = vector.load %arg4[%c1_84, %c0_85, %c0_86] : memref<2x32x32xbf16, #tpu.memory_space<vmem>>, vector<1x32x32xbf16>
    %207 = vector.shape_cast %206 : vector<1x32x32xbf16> to vector<32x32xbf16>
    %cst_87 = arith.constant dense<0.000000e+00> : vector<16x32xf32>
    %208 = tpu.matmul %205, %207, %cst_87 {dimension_numbers = #tpu.dot_dimension_numbers<[1], [0], [0], [1], [0, 0, 1, 1], [], []>} : vector<16x32xbf16>, vector<32x32xbf16>, vector<16x32xf32> -> vector<16x32xf32>
    %c1_88 = arith.constant 1 : index
    %c0_89 = arith.constant 0 : index
    %c0_90 = arith.constant 0 : index
    %209 = vector.load %arg5[%c1_88, %c0_89, %c0_90] : memref<2x1x32xf32, #tpu.memory_space<vmem>>, vector<1x1x32xf32>
    %210 = vector.shape_cast %209 : vector<1x1x32xf32> to vector<1x32xf32>
    %211 = vector.broadcast %210 : vector<1x32xf32> to vector<16x32xf32>
    %212 = arith.addf %208, %211 : vector<16x32xf32>
    %213 = arith.addf %151, %212 : vector<16x32xf32>
    %c1_91 = arith.constant 1 : index
    %c0_92 = arith.constant 0 : index
    %c0_93 = arith.constant 0 : index
    %214 = vector.load %arg12[%c1_91, %c0_92, %c0_93] : memref<2x1x32xf32, #tpu.memory_space<vmem>>, vector<1x1x32xf32>
    %215 = vector.shape_cast %214 : vector<1x1x32xf32> to vector<1x32xf32>
    %c1_94 = arith.constant 1 : index
    %c0_95 = arith.constant 0 : index
    %c0_96 = arith.constant 0 : index
    %216 = vector.load %arg13[%c1_94, %c0_95, %c0_96] : memref<2x1x32xf32, #tpu.memory_space<vmem>>, vector<1x1x32xf32>
    %217 = vector.shape_cast %216 : vector<1x1x32xf32> to vector<1x32xf32>
    %cst_97 = arith.constant dense<0.000000e+00> : vector<16xf32>
    %218 = vector.multi_reduction <add>, %213, %cst_97 [1] : vector<16x32xf32> to vector<16xf32>
    %219 = vector.shape_cast %218 : vector<16xf32> to vector<16x1xf32>
    %cst_98 = arith.constant 3.200000e+01 : f32
    %220 = vector.broadcast %cst_98 : f32 to vector<16x1xf32>
    %221 = arith.divf %219, %220 : vector<16x1xf32>
    %222 = vector.broadcast %221 : vector<16x1xf32> to vector<16x32xf32>
    %223 = arith.subf %213, %222 : vector<16x32xf32>
    %224 = arith.mulf %223, %223 : vector<16x32xf32>
    %cst_99 = arith.constant dense<0.000000e+00> : vector<16xf32>
    %225 = vector.multi_reduction <add>, %224, %cst_99 [1] : vector<16x32xf32> to vector<16xf32>
    %226 = vector.shape_cast %225 : vector<16xf32> to vector<16x1xf32>
    %cst_100 = arith.constant 3.200000e+01 : f32
    %227 = vector.broadcast %cst_100 : f32 to vector<16x1xf32>
    %228 = arith.divf %226, %227 : vector<16x1xf32>
    %cst_101 = arith.constant 9.99999974E-6 : f32
    %229 = vector.broadcast %cst_101 : f32 to vector<16x1xf32>
    %230 = arith.addf %228, %229 : vector<16x1xf32>
    %231 = math.rsqrt %230 : vector<16x1xf32>
    %232 = vector.broadcast %231 : vector<16x1xf32> to vector<16x32xf32>
    %233 = arith.mulf %223, %232 : vector<16x32xf32>
    %234 = vector.broadcast %215 : vector<1x32xf32> to vector<16x32xf32>
    %235 = arith.mulf %234, %233 : vector<16x32xf32>
    %236 = vector.broadcast %217 : vector<1x32xf32> to vector<16x32xf32>
    %237 = arith.addf %235, %236 : vector<16x32xf32>
    %238 = arith.truncf %237 : vector<16x32xf32> to vector<16x32xbf16>
    %c1_102 = arith.constant 1 : index
    %c0_103 = arith.constant 0 : index
    %c0_104 = arith.constant 0 : index
    %239 = vector.load %arg6[%c1_102, %c0_103, %c0_104] : memref<2x32x128xbf16, #tpu.memory_space<vmem>>, vector<1x32x128xbf16>
    %240 = vector.shape_cast %239 : vector<1x32x128xbf16> to vector<32x128xbf16>
    %cst_105 = arith.constant dense<0.000000e+00> : vector<16x128xf32>
    %241 = tpu.matmul %238, %240, %cst_105 {dimension_numbers = #tpu.dot_dimension_numbers<[1], [0], [0], [1], [0, 0, 1, 1], [], []>} : vector<16x32xbf16>, vector<32x128xbf16>, vector<16x128xf32> -> vector<16x128xf32>
    %c1_106 = arith.constant 1 : index
    %c0_107 = arith.constant 0 : index
    %c0_108 = arith.constant 0 : index
    %242 = vector.load %arg7[%c1_106, %c0_107, %c0_108] : memref<2x1x128xf32, #tpu.memory_space<vmem>>, vector<1x1x128xf32>
    %243 = vector.shape_cast %242 : vector<1x1x128xf32> to vector<1x128xf32>
    %244 = vector.broadcast %243 : vector<1x128xf32> to vector<16x128xf32>
    %245 = arith.addf %241, %244 : vector<16x128xf32>
    %cst_109 = arith.constant 5.000000e-01 : f32
    %246 = vector.broadcast %cst_109 : f32 to vector<16x128xf32>
    %247 = arith.mulf %246, %245 : vector<16x128xf32>
    %cst_110 = arith.constant 4.471500e-02 : f32
    %248 = vector.broadcast %cst_110 : f32 to vector<16x128xf32>
    %249 = arith.mulf %248, %245 : vector<16x128xf32>
    %250 = arith.mulf %249, %245 : vector<16x128xf32>
    %251 = arith.mulf %250, %245 : vector<16x128xf32>
    %252 = arith.addf %245, %251 : vector<16x128xf32>
    %cst_111 = arith.constant 0.797884583 : f32
    %253 = vector.broadcast %cst_111 : f32 to vector<16x128xf32>
    %254 = arith.mulf %253, %252 : vector<16x128xf32>
    %255 = math.tanh %254 : vector<16x128xf32>
    %cst_112 = arith.constant 1.000000e+00 : f32
    %256 = vector.broadcast %cst_112 : f32 to vector<16x128xf32>
    %257 = arith.addf %256, %255 : vector<16x128xf32>
    %258 = arith.mulf %247, %257 : vector<16x128xf32>
    %259 = arith.truncf %258 : vector<16x128xf32> to vector<16x128xbf16>
    %c1_113 = arith.constant 1 : index
    %c0_114 = arith.constant 0 : index
    %c0_115 = arith.constant 0 : index
    %260 = vector.load %arg8[%c1_113, %c0_114, %c0_115] : memref<2x128x32xbf16, #tpu.memory_space<vmem>>, vector<1x128x32xbf16>
    %261 = vector.shape_cast %260 : vector<1x128x32xbf16> to vector<128x32xbf16>
    %cst_116 = arith.constant dense<0.000000e+00> : vector<16x32xf32>
    %262 = tpu.matmul %259, %261, %cst_116 {dimension_numbers = #tpu.dot_dimension_numbers<[1], [0], [0], [1], [0, 0, 1, 1], [], []>} : vector<16x128xbf16>, vector<128x32xbf16>, vector<16x32xf32> -> vector<16x32xf32>
    %c1_117 = arith.constant 1 : index
    %c0_118 = arith.constant 0 : index
    %c0_119 = arith.constant 0 : index
    %263 = vector.load %arg9[%c1_117, %c0_118, %c0_119] : memref<2x1x32xf32, #tpu.memory_space<vmem>>, vector<1x1x32xf32>
    %264 = vector.shape_cast %263 : vector<1x1x32xf32> to vector<1x32xf32>
    %265 = vector.broadcast %264 : vector<1x32xf32> to vector<16x32xf32>
    %266 = arith.addf %262, %265 : vector<16x32xf32>
    %267 = arith.addf %213, %266 : vector<16x32xf32>
    %c0_120 = arith.constant 0 : index
    %c0_121 = arith.constant 0 : index
    %268 = vector.load %arg14[%c0_120, %c0_121] : memref<1x32xf32, #tpu.memory_space<vmem>>, vector<1x32xf32>
    %c0_122 = arith.constant 0 : index
    %c0_123 = arith.constant 0 : index
    %269 = vector.load %arg15[%c0_122, %c0_123] : memref<1x32xf32, #tpu.memory_space<vmem>>, vector<1x32xf32>
    %cst_124 = arith.constant dense<0.000000e+00> : vector<16xf32>
    %270 = vector.multi_reduction <add>, %267, %cst_124 [1] : vector<16x32xf32> to vector<16xf32>
    %271 = vector.shape_cast %270 : vector<16xf32> to vector<16x1xf32>
    %cst_125 = arith.constant 3.200000e+01 : f32
    %272 = vector.broadcast %cst_125 : f32 to vector<16x1xf32>
    %273 = arith.divf %271, %272 : vector<16x1xf32>
    %274 = vector.broadcast %273 : vector<16x1xf32> to vector<16x32xf32>
    %275 = arith.subf %267, %274 : vector<16x32xf32>
    %276 = arith.mulf %275, %275 : vector<16x32xf32>
    %cst_126 = arith.constant dense<0.000000e+00> : vector<16xf32>
    %277 = vector.multi_reduction <add>, %276, %cst_126 [1] : vector<16x32xf32> to vector<16xf32>
    %278 = vector.shape_cast %277 : vector<16xf32> to vector<16x1xf32>
    %cst_127 = arith.constant 3.200000e+01 : f32
    %279 = vector.broadcast %cst_127 : f32 to vector<16x1xf32>
    %280 = arith.divf %278, %279 : vector<16x1xf32>
    %cst_128 = arith.constant 9.99999974E-6 : f32
    %281 = vector.broadcast %cst_128 : f32 to vector<16x1xf32>
    %282 = arith.addf %280, %281 : vector<16x1xf32>
    %283 = math.rsqrt %282 : vector<16x1xf32>
    %284 = vector.broadcast %283 : vector<16x1xf32> to vector<16x32xf32>
    %285 = arith.mulf %275, %284 : vector<16x32xf32>
    %286 = vector.broadcast %268 : vector<1x32xf32> to vector<16x32xf32>
    %287 = arith.mulf %286, %285 : vector<16x32xf32>
    %288 = vector.broadcast %269 : vector<1x32xf32> to vector<16x32xf32>
    %289 = arith.addf %287, %288 : vector<16x32xf32>
    %290 = arith.truncf %289 : vector<16x32xf32> to vector<16x32xbf16>
    %c0_129 = arith.constant 0 : index
    %c0_130 = arith.constant 0 : index
    %291 = vector.load %arg16[%c0_129, %c0_130] : memref<32x128xbf16, #tpu.memory_space<vmem>>, vector<32x128xbf16>
    %cst_131 = arith.constant dense<0.000000e+00> : vector<16x128xf32>
    %292 = tpu.matmul %290, %291, %cst_131 {dimension_numbers = #tpu.dot_dimension_numbers<[1], [0], [0], [1], [0, 0, 1, 1], [], []>} : vector<16x32xbf16>, vector<32x128xbf16>, vector<16x128xf32> -> vector<16x128xf32>
    %c0_132 = arith.constant 0 : index
    %c0_133 = arith.constant 0 : index
    %293 = vector.load %arg17[%c0_132, %c0_133] : memref<1x128xf32, #tpu.memory_space<vmem>>, vector<1x128xf32>
    %cst_134 = arith.constant 5.65685415 : f32
    %294 = vector.broadcast %cst_134 : f32 to vector<1x128xf32>
    %295 = arith.mulf %293, %294 : vector<1x128xf32>
    %296 = vector.broadcast %295 : vector<1x128xf32> to vector<16x128xf32>
    %297 = arith.mulf %296, %292 : vector<16x128xf32>
    %c0_135 = arith.constant 0 : index
    %c0_136 = arith.constant 0 : index
    %298 = vector.load %arg18[%c0_135, %c0_136] : memref<16x128xf32, #tpu.memory_space<vmem>>, vector<16x128xf32>
    tpu.vector_store %arg18[%c0_135, %c0_136], %297 {strides = array<i32>} : memref<16x128xf32, #tpu.memory_space<vmem>>, vector<16x128xf32>,
    return
  }
}

</mosaic_0001>

<bundles_post_ra>
// kernel: ngpt_forward.1
= control target key start
LH: loop header
LB: loop body
LE: loop exit
PB: predicated region body
PF: predicated region fallthrough
CT: control target
= control target key end

     0   :  { %s5658_s0 = inlined_call_operand.vmem [shape: s32[16,1], index: 0, kind: input, shape index: {}]   ;;  %s5659_s1 = inlined_call_operand.vmem [shape: bf16[128,32], index: 1, kind: input, shape index: {}]   ;;  %s5660_s2 = inlined_call_operand.vmem [shape: f32[16,32], index: 2, kind: input, shape index: {}]   ;;  %s5661_s3 = inlined_call_operand.vmem [shape: bf16[2,32,96], index: 3, kind: input, shape index: {}]   ;;  %s5662_s4 = inlined_call_operand.vmem [shape: bf16[2,32,32], index: 4, kind: input, shape index: {}]   ;;  %s5663_s5 = inlined_call_operand.vmem [shape: f32[2,1,32], index: 5, kind: input, shape index: {}]   ;;  %s5664_s6 = inlined_call_operand.vmem [shape: bf16[2,32,128], index: 6, kind: input, shape index: {}]   ;;  %s5665_s7 = inlined_call_operand.vmem [shape: f32[2,1,128], index: 7, kind: input, shape index: {}]   ;;  %s5666_s8 = inlined_call_operand.vmem [shape: bf16[2,128,32], index: 8, kind: input, shape index: {}]   ;;  %s5667_s9 = inlined_call_operand.vmem [shape: f32[2,1,32], index: 9, kind: input, shape index: {}]   ;;  %s5668_s10 = inlined_call_operand.vmem [shape: f32[2,1,32], index: 10, kind: input, shape index: {}]   ;;  %s5669_s11 = inlined_call_operand.vmem [shape: f32[2,1,32], index: 11, kind: input, shape index: {}]   ;;  %s5670_s12 = inlined_call_operand.vmem [shape: f32[2,1,32], index: 12, kind: input, shape index: {}]   ;;  %s5671_s13 = inlined_call_operand.vmem [shape: f32[2,1,32], index: 13, kind: input, shape index: {}]   ;;  %s5672_s14 = inlined_call_operand.vmem [shape: f32[1,32], index: 14, kind: input, shape index: {}]   ;;  %s5673_s15 = inlined_call_operand.vmem [shape: f32[1,32], index: 15, kind: input, shape index: {}]   ;;  %s5674_s16 = inlined_call_operand.vmem [shape: bf16[32,128], index: 16, kind: input, shape index: {}]   ;;  %s5675_s17 = inlined_call_operand.vmem [shape: f32[1,128], index: 17, kind: input, shape index: {}]   ;;  %s5676_s18 = inlined_call_operand.hbm [shape: f32[16,128], index: 18, kind: output, shape index: {}]  }
   0x1   :  { %5687 = sst [smem:[#allocation5_spill]] %s5658_s0 }
   0x2   :  { %5688 = sst [smem:[#allocation6_spill]] %s5659_s1 }
   0x3   :  { %5689 = sst [smem:[#allocation7_spill]] %s5660_s2 }
   0x4   :  { %s5690_s29 = sld [smem:[#allocation5_spill]]  ;;  %v4716_v1 = vmov 0   ;;  %v4717_v2 = vmov 0.0   ;;  %s5691_s19 = sld [smem:[#allocation6_spill]]  ;;  %vm4718_vm0 = vmmov 0  }
   0x5   :  { %4525 = vset.pattern.permute.xlu0 %v4716_v1  ;;  %4289 = vmatprep.subr.bf16.mxu0 %v4717_v2 }
   0x6   :  { %4309 = vmatprep.subr.bf16.mxu1 %v4717_v2  ;;  %4305 = vmatprep.mubr.msk.bf16.mxu0 %vm4718_vm0, %v4717_v2 }
   0x7   :  { %4313 = vmatprep.mubr.msk.bf16.mxu1 %vm4718_vm0, %v4717_v2 }
   0xa   :  { %v61_v0 = vld [vmem:[%s5690_s29] sm:$0xff]  ;;  %v62_v4 = vld [vmem:[%s5690_s29 + $0x8] sm:$0xff]  ;;  %v4558_v6 = vld [vmem:[%s5691_s19 + $0x10] sm:$0xff]  }
   0xb   :  { %v4556_v3 = vld [vmem:[%s5691_s19] sm:$0xff]   ;;  %66 = vperm.xlu0 %4525, %v61_v0   ;;  %v4557_v5 = vld [vmem:[%s5691_s19 + $0x8] sm:$0xff]   ;;  %v4559_v7 = vld [vmem:[%s5691_s19 + $0x18] sm:$0xff]  }
   0xc   :  { %4290 = vmatpush3.bf16.msra.mxu0 %v4556_v3  ;;  %v4560_v8 = vld [vmem:[%s5691_s19 + $0x20] sm:$0xff]   ;;  %v4561_v9 = vld [vmem:[%s5691_s19 + $0x28] sm:$0xff]   ;;  %v4562_v10 = vld [vmem:[%s5691_s19 + $0x30] sm:$0xff]  }
   0xd   :  { %4291 = vmatprep.subr.bf16.mxu0 %v4717_v2  ;;  %v4563_v11 = vld [vmem:[%s5691_s19 + $0x38] sm:$0xff]  }
   0xf   :  { %69 = vperm.xlu0 %4525, %v62_v4  }
  0x10   :  { %4292 = vmatpush3.bf16.msra.mxu0 %v4557_v5 }
  0x11   :  { %4293 = vmatprep.subr.bf16.mxu0 %v4717_v2 }
  0x14   :  { %4294 = vmatpush3.bf16.msra.mxu0 %v4558_v6 }
  0x15   :  { %4295 = vmatprep.subr.bf16.mxu0 %v4717_v2 }
  0x18   :  { %4296 = vmatpush3.bf16.msra.mxu0 %v4559_v7 }
  0x19   :  { %4297 = vmatprep.subr.bf16.mxu0 %v4717_v2 }
  0x1c   :  { %4298 = vmatpush3.bf16.msra.mxu0 %v4560_v8 }
  0x1d   :  { %4299 = vmatprep.subr.bf16.mxu0 %v4717_v2 }
  0x20   :  { %4300 = vmatpush3.bf16.msra.mxu0 %v4561_v9 }
  0x21   :  { %4301 = vmatprep.subr.bf16.mxu0 %v4717_v2 }
  0x24   :  { %4302 = vmatpush3.bf16.msra.mxu0 %v4562_v10 }
  0x25   :  { %4303 = vmatprep.subr.bf16.mxu0 %v4717_v2 }
  0x26   :  { %23 = vsyncpa [#allocation3], 0  ;;  %v63_v12 = vlaneseq  ;;  %v4719_v16 = vmov 1.0|1.0   ;;  %s5692_s22 = sld [smem:[#allocation7_spill]]  ;;  %vm185_vm4 = vcmask 261120  }
  0x27   :  { %v4564_v51 = vld [vmem:[%s5661_s3] sm:$0xff]   ;;  %v4565_v52 = vld [vmem:[%s5661_s3 + $0x8] sm:$0xff]   ;;  %s4720_s30 = smov 112   ;;  %s4721_s0 = smov 120   ;;  %vm248_vm5 = vcmask 64512   ;;  %vm1212_vm12 = vcmask 130048  }
  0x28   :  { %4304 = vmatpush3.bf16.msra.mxu0 %v4563_v11  ;;  %v4881_v14 = vand.u32 127, %v63_v12  ;;  %4310 = vmatpush3.bf16.msra.mxu1 %v4564_v51  ;;  %v4065_v61 = vld [vmem:[%s5668_s10] ss:$0 sm:$0xff]  ;;  %s4722_s1 = smov 104   ;;  %s4723_s20 = smov 96   ;;  %vm1781_vm13 = vcmask 195584  }
  0x29   :  { %4347 = vmatprep.subr.bf16.mxu0 %v4717_v2  ;;  %4311 = vmatprep.subr.bf16.mxu1 %v4717_v2  ;;  %v4066_v3 = vld [vmem:[%s5669_s11] ss:$0 sm:$0xff]  ;;  %s4724_s19 = smov 88   ;;  %s4725_s21 = smov 80  }
  0x2a   :  { %s5680_s2 = smov 8   ;;  %s5686_s23 = smov 56  }
  0x2b   :  { %s5685_s24 = smov 64   ;;  %s5684_s25 = smov 48  }
  0x2c   :  { %v196_v17 = vld [vmem:[%s5692_s22] sm:$0xff]  ;;  %4312 = vmatpush3.bf16.msra.mxu1 %v4565_v52  ;;  %s4726_s22 = smov 72   ;;  %s5683_s26 = smov 40  }
  0x2d   :  { %v197_v18 = vmul.f32 %v196_v17, %v196_v17  ;;  %4317 = vmatprep.subr.bf16.mxu1 %v4717_v2  ;;  %s5682_s28 = smov 16   ;;  %s5679_s29 = smov 24  }
  0x2e   :  { %s5699_s27 = smov 24  }
  0x2f   :  { %v198_v19 = vsel %vm185_vm4, %v197_v18, 0.0  ;;  %v4939_v18 = vshrl.u32 %v63_v12, 7 }
  0x30   :  { %199 = vadd.xlane.f32.xlu0 %v198_v19  ;;  %v208_v19 = vcombine.low %v4716_v1, %v4716_v1 }
  0x31   :  { %v251_v12 = vcombine.low %v4939_v18, %v4939_v18  ;;  %vm274_vm8 = vcmp.le.s32.totalorder %v4881_v14, %v4939_v18 }
  0x8a   :  { %v67_v13 = vpop.permute.xlu0 %66 }
  0x8b   :  { %vm71_vm1 = vcmp.eq.s32.totalorder %v67_v13, %v4881_v14 }
  0x8e   :  { %v70_v15 = vpop.permute.xlu0 %69 }
  0x8f   :  { %vm72_vm2 = vcmp.eq.s32.totalorder %v70_v15, %v4881_v14  ;;  %v4727_v15 = vmov 1983009808  }
  0x90   :  { %vm4063_vm3 = vmpackc.low %vm72_vm2, %vm71_vm1 }
  0x91   :  { %4306 = vmatmul.mubr.msk.bf16.vlgmr.msra.gmra.mrb[0].mxu0 %vm4063_vm3, %v4719_v16  ;;  %v210_v16 = vunpack.c.l.s4 %v4727_v15 }
  0x92   :  { %4349 = vmatprep.mubr.msk.bf16.mxu0 %vm4718_vm0, %v4717_v2 }
  0xbd   :  { %v200_v28 = vpop.xlane.xlu0 %199 }
  0xbe   :  { %4594 = vrsqrt.f32 %v200_v28  ;;  %v4729_v28 = vmov 1  }
  0xc8   :  { %v4595_v31 = vpop.eup %4594 }
  0xc9   :  { %v202_v32 = vmul.f32 %v4595_v31, %v196_v17  ;;  %v211_v17 = vunpack.c.0.s8 %v210_v16 }
 0x164   :  { %v176_v20 = vpop.f32.mrb[0].mxu0 }
 0x165   :  { %v4307_v21 = vpop.f32.mrb[1].mxu0  ;;  %v183_v22 = vmul.f32 %v176_v20, %v176_v20 }
 0x166   :  { %v179_v23 = vpop.f32.mrb[2].mxu0  ;;  %v4728_v21 = vmov 1934713408  }
 0x167   :  { %v184_v24 = vmul.f32 %v179_v23, %v179_v23  ;;  %v4308_v25 = vpop.f32.mrb[3].mxu0  ;;  %v186_v26 = vsel %vm185_vm4, %v183_v22, 0.0  ;;  %v218_v22 = vunpack.c.l.s4 %v4728_v21 }
 0x168   :  { %187 = vadd.xlane.f32.xlu1 %v186_v26 }
 0x169   :  { %v189_v27 = vsel %vm185_vm4, %v184_v24, 0.0  ;;  %v219_v24 = vunpack.c.0.s8 %v218_v22 }
 0x16b   :  { %v4948_v26 = vsub.s32 %v219_v24, %v4939_v18 }
 0x16c   :  { %190 = vadd.xlane.f32.xlu1 %v189_v27 }
 0x1f5   :  { %v188_v29 = vpop.xlane.xlu1 %187 }
 0x1f6   :  { %4596 = vrsqrt.f32 %v188_v29  ;;  %v226_v29 = vcombine.low %v4729_v28, %v4729_v28 }
 0x1f9   :  { %v191_v30 = vpop.xlane.xlu1 %190 }
 0x1fa   :  { %4598 = vrsqrt.f32 %v191_v30 }
 0x200   :  { %v4597_v33 = vpop.eup %4596 }
 0x201   :  { %v194_v34 = vmul.f32 %v4597_v33, %v176_v20  ;;  %v4944_v20 = vsub.s32 %v211_v17, %v4939_v18 }
 0x203   :  { %v4893_v35 = vadd.f32 %v202_v32, %v194_v34  ;;  %v258_v31 = vrot.slane %v251_v12, %v4944_v20 }
 0x204   :  { %v4599_v36 = vpop.eup %4598 }
 0x205   :  { %v282_v37 = vsel %vm185_vm4, %v4893_v35, 0.0  ;;  %v195_v38 = vmul.f32 %v4599_v36, %v179_v23  ;;  %v215_v23 = vrot.slane %v208_v19, %v4944_v20  ;;  %v259_v33 = vcombine.low %v258_v31, %v258_v31 }
 0x206   :  { %283 = vadd.xlane.f32.xlu1 %v282_v37 }
 0x207   :  { %v4897_v39 = vadd.f32 %v202_v32, %v195_v38  ;;  %v216_v25 = vcombine.low %v215_v23, %v215_v23  ;;  %v233_v32 = vrot.slane %v226_v29, %v4944_v20  ;;  %v4961_v36 = vrot.slane %v259_v33, %v4948_v26 }
 0x209   :  { %v285_v40 = vsel %vm185_vm4, %v4897_v39, 0.0  ;;  %v4951_v27 = vrot.slane %v216_v25, %v4948_v26  ;;  %v234_v34 = vcombine.low %v233_v32, %v233_v32  ;;  %v268_v38 = vcombine.high %v4961_v36, %v4961_v36 }
 0x20a   :  { %286 = vadd.xlane.f32.xlu1 %v285_v40 }
 0x20b   :  { %v225_v30 = vcombine.high %v4951_v27, %v4951_v27  ;;  %v4964_v37 = vrot.slane %v234_v34, %v4948_v26 }
 0x20d   :  { %v243_v40 = vcombine.high %v4964_v37, %v4964_v37 }
 0x293   :  { %v284_v41 = vpop.xlane.xlu1 %283 }
 0x294   :  { %v289_v42 = vmul.f32 0.03125, %v284_v41 }
 0x296   :  { %v291_v43 = vsub.f32 %v4893_v35, %v289_v42 }
 0x297   :  { %v287_v44 = vpop.xlane.xlu1 %286 }
 0x298   :  { %v290_v45 = vmul.f32 0.03125, %v287_v44  ;;  %v293_v46 = vmul.f32 %v291_v43, %v291_v43 }
 0x29a   :  { %v292_v47 = vsub.f32 %v4897_v39, %v290_v45  ;;  %v295_v48 = vsel %vm185_vm4, %v293_v46, 0.0 }
 0x29b   :  { %296 = vadd.xlane.f32.xlu1 %v295_v48 }
 0x29c   :  { %v294_v49 = vmul.f32 %v292_v47, %v292_v47 }
 0x29e   :  { %v298_v50 = vsel %vm185_vm4, %v294_v49, 0.0 }
 0x29f   :  { %299 = vadd.xlane.f32.xlu1 %v298_v50 }
 0x328   :  { %v297_v53 = vpop.xlane.xlu1 %296 }
 0x329   :  { %v301_v54 = vmul.f32 0.03125, %v297_v53 }
 0x32b   :  { %v303_v55 = vadd.f32 1e-05, %v301_v54 }
 0x32c   :  { %v300_v56 = vpop.xlane.xlu1 %299 }
 0x32d   :  { %4600 = vrsqrt.f32 %v303_v55  ;;  %v302_v57 = vmul.f32 0.03125, %v300_v56 }
 0x32f   :  { %v304_v58 = vadd.f32 1e-05, %v302_v57 }
 0x331   :  { %4602 = vrsqrt.f32 %v304_v58 }
 0x337   :  { %v4601_v59 = vpop.eup %4600 }
 0x338   :  { %v307_v60 = vmul.f32 %v4601_v59, %v291_v43 }
 0x33a   :  { %v315_v0 = vmul.f32 %v4065_v61, %v307_v60 }
 0x33b   :  { %v4603_v62 = vpop.eup %4602 }
 0x33c   :  { %v308_v63 = vmul.f32 %v4603_v62, %v292_v47  ;;  %v323_v5 = vadd.f32 %v4066_v3, %v315_v0 }
 0x33e   :  { %v316_v4 = vmul.f32 %v4065_v61, %v308_v63 }
 0x340   :  { %v324_v6 = vadd.f32 %v4066_v3, %v316_v4 }
 0x342   :  { %v325_v7 = vpack.c.bf16 %v324_v6, %v323_v5 }
 0x344   :  { %4314 = vmatmul.mubr.msk.bf16.vlgmr.msra.gmra.mrb[0].mxu1 %vm185_vm4, %v325_v7 }
 0x345   :  { %4319 = vmatprep.mubr.msk.bf16.mxu1 %vm4718_vm0, %v4717_v2 }
 0x417   :  { %v379_v8 = vpop.f32.mrb[0].mxu1 }
 0x418   :  { %v4315_v9 = vpop.f32.mrb[1].mxu1 }
 0x419   :  { %v382_v10 = vpop.f32.mrb[2].mxu1 }
 0x41a   :  { %v4922_v11 = vpack.c.bf16 %v382_v10, %v379_v8  ;;  %v4316_v13 = vpop.f32.mrb[3].mxu1 }
 0x41c   :  { %390 = vrot.lane.b32.xlu0 %v4922_v11, %s4720_s30  ;;  %388 = vrot.lane.b32.xlu1 %v4922_v11, %s4721_s0  ;;  %v414_v52 = vshrl.u32 %v4922_v11, 16 }
 0x420   :  { %392 = vrot.lane.b32.xlu1 %v4922_v11, %s4722_s1  ;;  %244 = vrot.lane.b32.xlu0 %v225_v30, %s5680_s2 }
 0x424   :  { %394 = vrot.lane.b32.xlu1 %v4922_v11, %s4723_s20  ;;  %269 = vrot.lane.b32.xlu0 %v268_v38, %s5680_s2 }
 0x428   :  { %396 = vrot.lane.b32.xlu1 %v4922_v11, %s4724_s19 }
 0x42c   :  { %398 = vrot.lane.b32.xlu1 %v4922_v11, %s4725_s21 }
 0x430   :  { %400 = vrot.lane.b32.xlu1 %v4922_v11, %s4726_s22 }
 0x434   :  { %246 = vrot.lane.b32.xlu1 %v243_v40, %s5680_s2 }
 0x48e   :  { %v389_v41 = vpop.permute.xlu1 %388  ;;  %v391_v48 = vpop.permute.xlu0 %390 }
 0x48f   :  { %v412_v49 = vpack.i.b16 %v389_v41, %v4922_v11  ;;  %v415_v50 = vshrl.u32 %v389_v41, 16  ;;  %v422_v54 = vshrl.u32 %v391_v48, 16 }
 0x491   :  { %v416_v63 = vpack.i.b16 %v415_v50, %v414_v52 }
 0x492   :  { %v393_v42 = vpop.permute.xlu1 %392 }
 0x493   :  { %v423_v53 = vshrl.u32 %v393_v42, 16  ;;  %v420_v59 = vpack.i.b16 %v393_v42, %v391_v48 }
 0x495   :  { %v424_v0 = vpack.i.b16 %v423_v53, %v422_v54 }
 0x496   :  { %v395_v43 = vpop.permute.xlu1 %394 }
 0x497   :  { %v430_v51 = vshrl.u32 %v395_v43, 16 }
 0x49a   :  { %v397_v44 = vpop.permute.xlu1 %396 }
 0x49b   :  { %v428_v45 = vpack.i.b16 %v397_v44, %v395_v43  ;;  %v431_v46 = vshrl.u32 %v397_v44, 16 }
 0x49d   :  { %v432_v55 = vpack.i.b16 %v431_v46, %v430_v51  ;;  %v464_v56 = vcombine.low %v412_v49, %v428_v45  ;;  %v465_v57 = vcombine.high %v412_v49, %v428_v45 }
 0x49e   :  { %v399_v47 = vpop.permute.xlu1 %398 }
 0x49f   :  { %v438_v60 = vshrl.u32 %v399_v47, 16  ;;  %v472_v6 = vrot.slane %v464_v56, %v4944_v20  ;;  %v479_v7 = vrot.slane %v465_v57, %v4944_v20  ;;  %v598_v8 = vcombine.low %v416_v63, %v432_v55 }
 0x4a0   :  { %v599_v9 = vcombine.high %v416_v63, %v432_v55 }
 0x4a1   :  { %v606_v23 = vrot.slane %v598_v8, %v4944_v20 }
 0x4a2   :  { %v401_v58 = vpop.permute.xlu1 %400  ;;  %v613_v24 = vrot.slane %v599_v9, %v4944_v20 }
 0x4a3   :  { %v436_v61 = vpack.i.b16 %v401_v58, %v399_v47  ;;  %v439_v62 = vshrl.u32 %v401_v58, 16 }
 0x4a5   :  { %v440_v3 = vpack.i.b16 %v439_v62, %v438_v60  ;;  %v480_v4 = vcombine.low %v420_v59, %v436_v61  ;;  %v481_v5 = vcombine.high %v420_v59, %v436_v61 }
 0x4a7   :  { %v488_v10 = vrot.slane %v480_v4, %v4944_v20  ;;  %v495_v13 = vrot.slane %v481_v5, %v4944_v20  ;;  %v614_v15 = vcombine.low %v424_v0, %v440_v3  ;;  %v615_v16 = vcombine.high %v424_v0, %v440_v3 }
 0x4a9   :  { %v526_v17 = vcombine.low %v472_v6, %v488_v10  ;;  %v527_v19 = vcombine.high %v472_v6, %v488_v10  ;;  %v542_v21 = vcombine.low %v479_v7, %v495_v13  ;;  %v543_v22 = vcombine.high %v479_v7, %v495_v13 }
 0x4aa   :  { %v622_v25 = vrot.slane %v614_v15, %v4944_v20  ;;  %v629_v12 = vrot.slane %v615_v16, %v4944_v20 }
 0x4ab   :  { %v534_v28 = vrot.slane %v526_v17, %v4948_v26  ;;  %v541_v29 = vrot.slane %v527_v19, %v4948_v26  ;;  %v550_v30 = vrot.slane %v542_v21, %v4948_v26  ;;  %v557_v31 = vrot.slane %v543_v22, %v4948_v26 }
 0x4ac   :  { %v660_v32 = vcombine.low %v606_v23, %v622_v25  ;;  %v661_v33 = vcombine.high %v606_v23, %v622_v25  ;;  %v676_v34 = vcombine.low %v613_v24, %v629_v12  ;;  %v677_v38 = vcombine.high %v613_v24, %v629_v12 }
 0x4ad   :  { %v4070_v40 = vcombine.low %v534_v28, %v541_v29  ;;  %v4072_v41 = vcombine.high %v534_v28, %v541_v29  ;;  %v4074_v42 = vcombine.low %v550_v30, %v557_v31  ;;  %v4076_v43 = vcombine.high %v550_v30, %v557_v31 }
 0x4ae   :  { %v668_v44 = vrot.slane %v660_v32, %v4948_v26  ;;  %v675_v45 = vrot.slane %v661_v33, %v4948_v26  ;;  %v684_v46 = vrot.slane %v676_v34, %v4948_v26  ;;  %v691_v47 = vrot.slane %v677_v38, %v4948_v26 }
 0x4af   :  { %v740_v48 = vrot.slane %v4070_v40, %v4944_v20  ;;  %v756_v49 = vrot.slane %v4072_v41, %v4944_v20  ;;  %v772_v50 = vrot.slane %v4074_v42, %v4944_v20  ;;  %v788_v51 = vrot.slane %v4076_v43, %v4944_v20 }
 0x4b0   :  { %v4078_v52 = vcombine.low %v668_v44, %v675_v45  ;;  %v4080_v53 = vcombine.high %v668_v44, %v675_v45  ;;  %v4082_v54 = vcombine.low %v684_v46, %v691_v47  ;;  %v4084_v55 = vcombine.high %v684_v46, %v691_v47 }
 0x4b1   :  { %v797_v56 = vcombine.high %v740_v48, %v756_v49  ;;  %v821_v57 = vcombine.high %v772_v50, %v788_v51  ;;  %v796_v8 = vcombine.low %v740_v48, %v756_v49  ;;  %v820_v9 = vcombine.low %v772_v50, %v788_v51  ;;  %v245_v48 = vpop.permute.xlu0 %244 }
 0x4b2   :  { %v858_v58 = vrot.slane %v4078_v52, %v4944_v20  ;;  %v874_v59 = vrot.slane %v4080_v53, %v4944_v20  ;;  %v890_v60 = vrot.slane %v4082_v54, %v4944_v20  ;;  %v906_v61 = vrot.slane %v4084_v55, %v4944_v20 }
 0x4b3   :  { %v811_v62 = vrot.slane %v797_v56, %v4948_v26  ;;  %v835_v63 = vrot.slane %v821_v57, %v4948_v26  ;;  %v804_v21 = vrot.slane %v796_v8, %v4948_v26  ;;  %v828_v22 = vrot.slane %v820_v9, %v4948_v26  ;;  %v247_v57 = vpop.permute.xlu1 %246 }
 0x4b4   :  { %v915_v0 = vcombine.high %v858_v58, %v874_v59  ;;  %v939_v3 = vcombine.high %v890_v60, %v906_v61  ;;  %v914_v4 = vcombine.low %v858_v58, %v874_v59  ;;  %v938_v6 = vcombine.low %v890_v60, %v906_v61 }
 0x4b5   :  { %v846_v10 = vcombine.low %v811_v62, %v835_v63  ;;  %v844_v12 = vcombine.low %v804_v21, %v828_v22  ;;  %v847_v33 = vcombine.high %v811_v62, %v835_v63  ;;  %v845_v45 = vcombine.high %v804_v21, %v828_v22  ;;  %v270_v55 = vpop.permute.xlu0 %269 }
 0x4b6   :  { %v929_v5 = vrot.slane %v915_v0, %v4948_v26  ;;  %v953_v7 = vrot.slane %v939_v3, %v4948_v26  ;;  %v922_v16 = vrot.slane %v914_v4, %v4948_v26  ;;  %v946_v17 = vrot.slane %v938_v6, %v4948_v26 }
 0x4b7   :  { %v983_v25 = vshrl.u32 %v846_v10, 16  ;;  %v971_v34 = vshrl.u32 %v844_v12, 16  ;;  %v989_v44 = vshrl.u32 %v847_v33, 16  ;;  %v224_v49 = vcombine.low %v4951_v27, %v4951_v27 }
 0x4b8   :  { %v964_v13 = vcombine.low %v929_v5, %v953_v7  ;;  %v962_v24 = vcombine.low %v922_v16, %v946_v17  ;;  %v965_v31 = vcombine.high %v929_v5, %v953_v7  ;;  %v963_v43 = vcombine.high %v922_v16, %v946_v17 }
 0x4b9   :  { %v267_v51 = vcombine.low %v4961_v36, %v4961_v36  ;;  %v242_v53 = vcombine.low %v4964_v37, %v4964_v37  ;;  %v249_v54 = vsel %vm248_vm5, %v224_v49, %v245_v48  ;;  %v977_v27 = vshrl.u32 %v845_v45, 16 }
 0x4ba   :  { %v982_v15 = vpack.i.b16 %v964_v13, %v846_v10  ;;  %v984_v23 = vshrl.u32 %v964_v13, 16  ;;  %v970_v29 = vpack.i.b16 %v962_v24, %v844_v12  ;;  %v972_v32 = vshrl.u32 %v962_v24, 16 }
 0x4bb   :  { %v988_v38 = vpack.i.b16 %v965_v31, %v847_v33  ;;  %v990_v42 = vshrl.u32 %v965_v31, 16  ;;  %v976_v47 = vpack.i.b16 %v963_v43, %v845_v45  ;;  %v978_v52 = vshrl.u32 %v963_v43, 16 }
 0x4bc   :  { %v1012_v19 = vsel %vm248_vm5, %v982_v15, 0  ;;  %v985_v28 = vpack.i.b16 %v984_v23, %v983_v25  ;;  %v973_v40 = vpack.i.b16 %v972_v32, %v971_v34  ;;  %v271_v56 = vsel %vm248_vm5, %v267_v51, %v270_v55 }
 0x4bd   :  { %4318 = vmatpush3.bf16.xpose.msra.mxu1 %v1012_v19  ;;  %v1106_v41 = vsel %vm248_vm5, %v988_v38, 0  ;;  %v991_v46 = vpack.i.b16 %v990_v42, %v989_v44  ;;  %v979_v58 = vpack.i.b16 %v978_v52, %v977_v27  ;;  %vm272_vm6 = vcmp.eq.s32.totalorder %v249_v54, %v271_v56 }
 0x4be   :  { %4323 = vmatprep.subr.bf16.mxu1 %v4717_v2  ;;  %v1059_v30 = vsel %vm248_vm5, %v985_v28, 0  ;;  %v250_v59 = vsel %vm248_vm5, %v242_v53, %v247_v57  ;;  %v207_v36 = vadd.s32 8, %v4939_v18  ;;  %vm276_vm10 = vmand %vm272_vm6, %vm274_vm8  ;;  %v4731_v37 = vmov -inf  }
 0x4bf   :  { %v1153_v50 = vsel %vm248_vm5, %v991_v46, 0  ;;  %vm273_vm7 = vcmp.eq.s32.totalorder %v250_v59, %v271_v56  ;;  %v5039_v60 = vsel %vm276_vm10, 0.0, %v4731_v37 }
 0x4c0   :  { %vm275_vm9 = vcmp.le.s32.totalorder %v4881_v14, %v207_v36 }
 0x4c1   :  { %vm277_vm11 = vmand %vm273_vm7, %vm275_vm9 }
 0x4c2   :  { %v5041_v0 = vsel %vm277_vm11, 0.0, %v4731_v37 }
 0x4c4   :  { %4320 = vmatmul.mubr.msk.bf16.vlgmr.msra.gmra.mrb[4].mxu1 %vm248_vm5, %v970_v29 }
 0x4c5   :  { %4324 = vmatpush3.bf16.xpose.msra.mxu1 %v1059_v30  ;;  %4325 = vmatprep.mubr.msk.bf16.mxu1 %vm4718_vm0, %v4717_v2 }
 0x4c6   :  { %4329 = vmatprep.subr.bf16.mxu1 %v4717_v2 }
 0x4cc   :  { %4326 = vmatmul.mubr.msk.bf16.vlgmr.msra.gmra.mrb[8].mxu1 %vm248_vm5, %v973_v40 }
 0x4cd   :  { %4330 = vmatpush3.bf16.xpose.msra.mxu1 %v1106_v41  ;;  %4331 = vmatprep.mubr.msk.bf16.mxu1 %vm4718_vm0, %v4717_v2 }
 0x4ce   :  { %4335 = vmatprep.subr.bf16.mxu1 %v4717_v2 }
 0x4d4   :  { %4332 = vmatmul.mubr.msk.bf16.vlgmr.msra.gmra.mrb[12].mxu1 %vm248_vm5, %v976_v47 }
 0x4d5   :  { %4336 = vmatpush3.bf16.xpose.msra.mxu1 %v1153_v50  ;;  %4337 = vmatprep.mubr.msk.bf16.mxu1 %vm4718_vm0, %v4717_v2 }
 0x4d6   :  { %4341 = vmatprep.subr.bf16.mxu1 %v4717_v2 }
 0x4dc   :  { %4338 = vmatmul.mubr.msk.bf16.vlgmr.msra.gmra.mrb[16].mxu1 %vm248_vm5, %v979_v58 }
 0x4dd   :  { %4343 = vmatprep.mubr.msk.bf16.mxu1 %vm4718_vm0, %v4717_v2 }
 0x597   :  { %v1048_v61 = vpop.f32.mrb[4].mxu1 }
 0x598   :  { %v1196_v62 = vmul.f32 0.35355338, %v1048_v61  ;;  %v4321_v63 = vpop.f32.mrb[5].mxu1 }
 0x599   :  { %v1051_v3 = vpop.f32.mrb[6].mxu1 }
 0x59a   :  { %v1197_v4 = vmul.f32 0.35355338, %v1051_v3  ;;  %v4322_v5 = vpop.f32.mrb[7].mxu1  ;;  %v1204_v6 = vadd.f32 %v1196_v62, %v5039_v60 }
 0x59c   :  { %v1213_v7 = vsel %vm1212_vm12, %v1204_v6, -inf  ;;  %v1205_v14 = vadd.f32 %v1197_v4, %v5041_v0 }
 0x59d   :  { %1214 = vmax.xlane.f32.xlu1 %v1213_v7 }
 0x59e   :  { %v1216_v8 = vsel %vm1212_vm12, %v1205_v14, -inf }
 0x59f   :  { %1217 = vmax.xlane.f32.xlu0 %v1216_v8  ;;  %v1095_v9 = vpop.f32.mrb[8].mxu1 }
 0x5a0   :  { %v1198_v10 = vmul.f32 0.35355338, %v1095_v9  ;;  %v4327_v13 = vpop.f32.mrb[9].mxu1 }
 0x5a1   :  { %v1098_v15 = vpop.f32.mrb[10].mxu1 }
 0x5a2   :  { %v1199_v16 = vmul.f32 0.35355338, %v1098_v15  ;;  %v4328_v17 = vpop.f32.mrb[11].mxu1  ;;  %v1206_v19 = vadd.f32 %v1198_v10, %v5039_v60 }
 0x5a4   :  { %v1219_v21 = vsel %vm1212_vm12, %v1206_v19, -inf  ;;  %v1207_v22 = vadd.f32 %v1199_v16, %v5041_v0 }
 0x5a5   :  { %1220 = vmax.xlane.f32.xlu0 %v1219_v21 }
 0x5a6   :  { %v1222_v23 = vsel %vm1212_vm12, %v1207_v22, -inf }
 0x5a7   :  { %1223 = vmax.xlane.f32.xlu1 %v1222_v23  ;;  %v1142_v24 = vpop.f32.mrb[12].mxu1 }
 0x5a8   :  { %v1200_v25 = vmul.f32 0.35355338, %v1142_v24  ;;  %v4333_v12 = vpop.f32.mrb[13].mxu1 }
 0x5a9   :  { %v1145_v28 = vpop.f32.mrb[14].mxu1 }
 0x5aa   :  { %v1201_v29 = vmul.f32 0.35355338, %v1145_v28  ;;  %v4334_v30 = vpop.f32.mrb[15].mxu1  ;;  %v1208_v31 = vadd.f32 %v1200_v25, %v5039_v60 }
 0x5ac   :  { %v1225_v32 = vsel %vm1212_vm12, %v1208_v31, -inf  ;;  %v1209_v33 = vadd.f32 %v1201_v29, %v5041_v0 }
 0x5ad   :  { %1226 = vmax.xlane.f32.xlu0 %v1225_v32 }
 0x5ae   :  { %v1228_v34 = vsel %vm1212_vm12, %v1209_v33, -inf }
 0x5af   :  { %1229 = vmax.xlane.f32.xlu1 %v1228_v34  ;;  %v1189_v38 = vpop.f32.mrb[16].mxu1 }
 0x5b0   :  { %v1202_v40 = vmul.f32 0.35355338, %v1189_v38  ;;  %v4339_v41 = vpop.f32.mrb[17].mxu1 }
 0x5b1   :  { %v1192_v42 = vpop.f32.mrb[18].mxu1 }
 0x5b2   :  { %v1203_v43 = vmul.f32 0.35355338, %v1192_v42  ;;  %v4340_v44 = vpop.f32.mrb[19].mxu1  ;;  %v1210_v45 = vadd.f32 %v1202_v40, %v5039_v60 }
 0x5b4   :  { %v1231_v46 = vsel %vm1212_vm12, %v1210_v45, -inf  ;;  %v1211_v47 = vadd.f32 %v1203_v43, %v5041_v0 }
 0x5b5   :  { %1232 = vmax.xlane.f32.xlu0 %v1231_v46 }
 0x5b6   :  { %v1234_v48 = vsel %vm1212_vm12, %v1211_v47, -inf }
 0x5b7   :  { %1235 = vmax.xlane.f32.xlu1 %v1234_v48 }
 0x5c8   :  { %404 = vrot.lane.b32.xlu1 %v4922_v11, %s5686_s23 }
 0x5cb   :  { %402 = vrot.lane.b32.xlu0 %v4922_v11, %s5685_s24 }
 0x5cc   :  { %406 = vrot.lane.b32.xlu1 %v4922_v11, %s5684_s25 }
 0x5cf   :  { %408 = vrot.lane.b32.xlu0 %v4922_v11, %s5683_s26 }
 0x62a   :  { %v1215_v49 = vpop.xlane.xlu1 %1214 }
 0x62b   :  { %v1237_v50 = vsub.f32 %v1204_v6, %v1215_v49 }
 0x62c   :  { %v1218_v51 = vpop.xlane.xlu0 %1217 }
 0x62d   :  { %v1245_v52 = vmul.f32 1.442695, %v1237_v50  ;;  %v1238_v53 = vsub.f32 %v1205_v14, %v1218_v51 }
 0x62f   :  { %4604 = vpow2.f32 %v1245_v52  ;;  %v1247_v54 = vmul.f32 1.442695, %v1238_v53 }
 0x631   :  { %4606 = vpow2.f32 %v1247_v54 }
 0x632   :  { %v1221_v27 = vpop.xlane.xlu0 %1220 }
 0x633   :  { %v1239_v55 = vsub.f32 %v1206_v19, %v1221_v27 }
 0x634   :  { %v1224_v56 = vpop.xlane.xlu1 %1223 }
 0x635   :  { %v1249_v57 = vmul.f32 1.442695, %v1239_v55  ;;  %v1240_v58 = vsub.f32 %v1207_v22, %v1224_v56  ;;  %v5085_v22 = vpack.i.b16 %v4716_v1, %v4716_v1 }
 0x637   :  { %4608 = vpow2.f32 %v1249_v57  ;;  %v1251_v59 = vmul.f32 1.442695, %v1240_v58 }
 0x639   :  { %v5067_v36 = vpop.eup %4604  ;;  %4610 = vpow2.f32 %v1251_v59 }
 0x63a   :  { %v1227_v37 = vpop.xlane.xlu0 %1226  ;;  %v1261_v11 = vsel %vm1212_vm12, %v5067_v36, 0.0 }
 0x63b   :  { %v5071_v61 = vpop.eup %4606  ;;  %v1241_v62 = vsub.f32 %v1208_v31, %v1227_v37  ;;  %1262 = vadd.xlane.f32.xlu1 %v1261_v11 }
 0x63c   :  { %v1230_v63 = vpop.xlane.xlu1 %1229  ;;  %v1264_v3 = vsel %vm1212_vm12, %v5071_v61, 0.0 }
 0x63d   :  { %v1253_v4 = vmul.f32 1.442695, %v1241_v62  ;;  %v1242_v5 = vsub.f32 %v1209_v33, %v1230_v63  ;;  %1265 = vadd.xlane.f32.xlu0 %v1264_v3 }
 0x63f   :  { %4612 = vpow2.f32 %v1253_v4  ;;  %v1255_v6 = vmul.f32 1.442695, %v1242_v5 }
 0x641   :  { %v5075_v7 = vpop.eup %4608  ;;  %4614 = vpow2.f32 %v1255_v6 }
 0x642   :  { %v1233_v14 = vpop.xlane.xlu0 %1232  ;;  %v1267_v8 = vsel %vm1212_vm12, %v5075_v7, 0.0 }
 0x643   :  { %v5079_v9 = vpop.eup %4610  ;;  %v1243_v10 = vsub.f32 %v1210_v45, %v1233_v14  ;;  %1268 = vadd.xlane.f32.xlu0 %v1267_v8 }
 0x644   :  { %v1236_v13 = vpop.xlane.xlu1 %1235  ;;  %v1270_v15 = vsel %vm1212_vm12, %v5079_v9, 0.0 }
 0x645   :  { %v1257_v16 = vmul.f32 1.442695, %v1243_v10  ;;  %v1244_v17 = vsub.f32 %v1211_v47, %v1236_v13  ;;  %1271 = vadd.xlane.f32.xlu1 %v1270_v15 }
 0x646   :  { %v403_v19 = vpop.permute.xlu0 %402 }
 0x647   :  { %4616 = vpow2.f32 %v1257_v16  ;;  %v1259_v21 = vmul.f32 1.442695, %v1244_v17  ;;  %v446_v25 = vshrl.u32 %v403_v19, 16 }
 0x648   :  { %v405_v23 = vpop.permute.xlu1 %404 }
 0x649   :  { %v5087_v24 = vpop.eup %4612  ;;  %4618 = vpow2.f32 %v1259_v21  ;;  %v444_v12 = vpack.i.b16 %v405_v23, %v403_v19  ;;  %v447_v28 = vshrl.u32 %v405_v23, 16 }
 0x64a   :  { %v1273_v29 = vsel %vm1212_vm12, %v5087_v24, 0.0  ;;  %v409_v32 = vpop.permute.xlu0 %408 }
 0x64b   :  { %v5091_v30 = vpop.eup %4614  ;;  %v448_v31 = vpack.i.b16 %v447_v28, %v446_v25  ;;  %1274 = vadd.xlane.f32.xlu0 %v1273_v29  ;;  %v496_v33 = vcombine.high %v444_v12, %v5085_v22  ;;  %v455_v41 = vshrl.u32 %v409_v32, 16  ;;  %v503_v43 = vrot.slane %v444_v12, %v4944_v20 }
 0x64c   :  { %v407_v34 = vpop.permute.xlu1 %406  ;;  %v1276_v1 = vsel %vm1212_vm12, %v5091_v30, 0.0 }
 0x64d   :  { %v452_v38 = vpack.i.b16 %v409_v32, %v407_v34  ;;  %1277 = vadd.xlane.f32.xlu1 %v1276_v1  ;;  %v630_v40 = vcombine.high %v448_v31, %v5085_v22  ;;  %v454_v42 = vshrl.u32 %v407_v34, 16  ;;  %v510_v46 = vrot.slane %v496_v33, %v4944_v20 }
 0x64e   :  { %v637_v49 = vrot.slane %v448_v31, %v4944_v20 }
 0x64f   :  { %v511_v44 = vcombine.high %v452_v38, %v5085_v22  ;;  %v518_v45 = vrot.slane %v452_v38, %v4944_v20  ;;  %v456_v47 = vpack.i.b16 %v455_v41, %v454_v42  ;;  %v644_v53 = vrot.slane %v630_v40, %v4944_v20 }
 0x651   :  { %v5101_v48 = vpop.eup %4616  ;;  %v525_v50 = vrot.slane %v511_v44, %v4944_v20  ;;  %v558_v51 = vcombine.low %v503_v43, %v518_v45  ;;  %v559_v52 = vcombine.high %v503_v43, %v518_v45  ;;  %v645_v54 = vcombine.high %v456_v47, %v5085_v22 }
 0x652   :  { %v652_v27 = vrot.slane %v456_v47, %v4944_v20  ;;  %v1279_v55 = vsel %vm1212_vm12, %v5101_v48, 0.0 }
 0x653   :  { %v5110_v56 = vpop.eup %4618  ;;  %v566_v57 = vrot.slane %v558_v51, %v4948_v26  ;;  %v573_v58 = vrot.slane %v559_v52, %v4948_v26  ;;  %v574_v59 = vcombine.low %v510_v46, %v525_v50  ;;  %v575_v37 = vcombine.high %v510_v46, %v525_v50  ;;  %1280 = vadd.xlane.f32.xlu0 %v1279_v55 }
 0x654   :  { %v659_v11 = vrot.slane %v645_v54, %v4944_v20  ;;  %v692_v62 = vcombine.low %v637_v49, %v652_v27  ;;  %v693_v63 = vcombine.high %v637_v49, %v652_v27  ;;  %v1282_v3 = vsel %vm1212_vm12, %v5110_v56, 0.0 }
 0x655   :  { %v582_v4 = vrot.slane %v574_v59, %v4948_v26  ;;  %v589_v5 = vrot.slane %v575_v37, %v4948_v26  ;;  %v4071_v6 = vcombine.low %v566_v57, %v573_v58  ;;  %v4073_v14 = vcombine.high %v566_v57, %v573_v58  ;;  %1283 = vadd.xlane.f32.xlu1 %v1282_v3 }
 0x656   :  { %v700_v8 = vrot.slane %v692_v62, %v4948_v26  ;;  %v707_v10 = vrot.slane %v693_v63, %v4948_v26  ;;  %v708_v13 = vcombine.low %v644_v53, %v659_v11  ;;  %v709_v15 = vcombine.high %v644_v53, %v659_v11 }
 0x657   :  { %v747_v16 = vrot.slane %v4071_v6, %v4944_v20  ;;  %v763_v17 = vrot.slane %v4073_v14, %v4944_v20  ;;  %v4075_v19 = vcombine.low %v582_v4, %v589_v5  ;;  %v4077_v21 = vcombine.high %v582_v4, %v589_v5 }
 0x658   :  { %v716_v23 = vrot.slane %v708_v13, %v4948_v26  ;;  %v723_v25 = vrot.slane %v709_v15, %v4948_v26  ;;  %v4079_v12 = vcombine.low %v700_v8, %v707_v10  ;;  %v4081_v28 = vcombine.high %v700_v8, %v707_v10 }
 0x659   :  { %v779_v29 = vrot.slane %v4075_v19, %v4944_v20  ;;  %v795_v31 = vrot.slane %v4077_v21, %v4944_v20  ;;  %v812_v32 = vcombine.low %v747_v16, %v763_v17 }
 0x65a   :  { %v865_v33 = vrot.slane %v4079_v12, %v4944_v20  ;;  %v881_v34 = vrot.slane %v4081_v28, %v4944_v20  ;;  %v4083_v1 = vcombine.low %v716_v23, %v723_v25  ;;  %v4085_v38 = vcombine.high %v716_v23, %v723_v25 }
 0x65b   :  { %v836_v40 = vcombine.low %v779_v29, %v795_v31  ;;  %v819_v44 = vrot.slane %v812_v32, %v4948_v26 }
 0x65c   :  { %v897_v41 = vrot.slane %v4083_v1, %v4944_v20  ;;  %v913_v42 = vrot.slane %v4085_v38, %v4944_v20  ;;  %v930_v43 = vcombine.low %v865_v33, %v881_v34 }
 0x65d   :  { %v843_v45 = vrot.slane %v836_v40, %v4948_v26 }
 0x65e   :  { %v954_v46 = vcombine.low %v897_v41, %v913_v42  ;;  %v937_v50 = vrot.slane %v930_v43, %v4948_v26 }
 0x65f   :  { %v848_v47 = vcombine.low %v819_v44, %v843_v45  ;;  %v849_v49 = vcombine.high %v819_v44, %v843_v45 }
 0x660   :  { %v961_v51 = vrot.slane %v954_v46, %v4948_v26 }
 0x661   :  { %v996_v54 = vshrl.u32 %v848_v47, 16  ;;  %v1004_v27 = vshrl.u32 %v849_v49, 16 }
 0x662   :  { %v966_v52 = vcombine.low %v937_v50, %v961_v51  ;;  %v967_v53 = vcombine.high %v937_v50, %v961_v51 }
 0x664   :  { %v994_v55 = vpack.i.b16 %v966_v52, %v848_v47  ;;  %v997_v57 = vshrl.u32 %v966_v52, 16  ;;  %v1002_v58 = vpack.i.b16 %v967_v53, %v849_v49  ;;  %v1005_v59 = vshrl.u32 %v967_v53, 16 }
 0x666   :  { %4342 = vmatpush3.bf16.msra.mxu1 %v994_v55  ;;  %v998_v37 = vpack.i.b16 %v997_v57, %v996_v54  ;;  %v1006_v11 = vpack.i.b16 %v1005_v59, %v1004_v27 }
 0x667   :  { %4353 = vmatprep.subr.bf16.mxu1 %v4717_v2 }
 0x668   :  { %4348 = vmatpush3.bf16.msra.mxu0 %v998_v37 }
 0x669   :  { %4359 = vmatprep.subr.bf16.mxu0 %v4717_v2 }
 0x6c8   :  { %v1263_v62 = vpop.xlane.xlu1 %1262 }
 0x6c9   :  { %4620 = vrcp.f32 %v1263_v62 }
 0x6ca   :  { %v1266_v63 = vpop.xlane.xlu0 %1265 }
 0x6cb   :  { %4622 = vrcp.f32 %v1266_v63 }
 0x6d0   :  { %v1269_v3 = vpop.xlane.xlu0 %1268 }
 0x6d1   :  { %4624 = vrcp.f32 %v1269_v3 }
 0x6d2   :  { %v1272_v4 = vpop.xlane.xlu1 %1271 }
 0x6d3   :  { %v4621_v5 = vpop.eup %4620  ;;  %4626 = vrcp.f32 %v1272_v4 }
 0x6d4   :  { %v1286_v14 = vmul.f32 %v4621_v5, %v5067_v36 }
 0x6d5   :  { %v4623_v6 = vpop.eup %4622 }
 0x6d6   :  { %v1288_v8 = vmul.f32 %v4623_v6, %v5071_v61 }
 0x6d8   :  { %v1275_v10 = vpop.xlane.xlu0 %1274  ;;  %v1301_v13 = vpack.c.bf16 %v1288_v8, %v1286_v14 }
 0x6d9   :  { %4628 = vrcp.f32 %v1275_v10 }
 0x6da   :  { %4344 = vmatmul.mubr.msk.bf16.vlgmr.msra.gmra.mrb[20].mxu1 %vm1212_vm12, %v1301_v13  ;;  %v1278_v15 = vpop.xlane.xlu1 %1277 }
 0x6db   :  { %v4625_v16 = vpop.eup %4624  ;;  %4354 = vmatpush3.bf16.msra.mxu1 %v1002_v58  ;;  %4630 = vrcp.f32 %v1278_v15  ;;  %4355 = vmatprep.mubr.msk.bf16.mxu1 %vm4718_vm0, %v4717_v2 }
 0x6dc   :  { %4365 = vmatprep.subr.bf16.mxu1 %v4717_v2  ;;  %v1290_v19 = vmul.f32 %v4625_v16, %v5075_v7 }
 0x6dd   :  { %v4627_v17 = vpop.eup %4626 }
 0x6de   :  { %v1292_v36 = vmul.f32 %v4627_v17, %v5079_v9 }
 0x6e0   :  { %v1281_v61 = vpop.xlane.xlu0 %1280  ;;  %v1302_v21 = vpack.c.bf16 %v1292_v36, %v1290_v19 }
 0x6e1   :  { %4632 = vrcp.f32 %v1281_v61 }
 0x6e2   :  { %4350 = vmatmul.mubr.msk.bf16.vlgmr.msra.gmra.mrb[4].mxu0 %vm1212_vm12, %v1302_v21  ;;  %v1284_v23 = vpop.xlane.xlu1 %1283 }
 0x6e3   :  { %v4629_v25 = vpop.eup %4628  ;;  %4360 = vmatpush3.bf16.msra.mxu0 %v1006_v11  ;;  %4634 = vrcp.f32 %v1284_v23  ;;  %4361 = vmatprep.mubr.msk.bf16.mxu0 %vm4718_vm0, %v4717_v2 }
 0x6e4   :  { %4373 = vmatprep.subr.bf16.mxu0 %v4717_v2  ;;  %v1294_v28 = vmul.f32 %v4629_v25, %v5087_v24 }
 0x6e5   :  { %v4631_v12 = vpop.eup %4630 }
 0x6e6   :  { %v1296_v7 = vmul.f32 %v4631_v12, %v5091_v30 }
 0x6e8   :  { %v1303_v9 = vpack.c.bf16 %v1296_v7, %v1294_v28 }
 0x6ea   :  { %4356 = vmatmul.mubr.msk.bf16.vlgmr.msra.gmra.mrb[24].mxu1 %vm1212_vm12, %v1303_v9 }
 0x6eb   :  { %v4633_v29 = vpop.eup %4632  ;;  %4369 = vmatprep.mubr.msk.bf16.mxu1 %vm4718_vm0, %v4717_v2 }
 0x6ec   :  { %v1298_v32 = vmul.f32 %v4633_v29, %v5101_v48 }
 0x6ed   :  { %v4635_v31 = vpop.eup %4634 }
 0x6ee   :  { %v1300_v33 = vmul.f32 %v4635_v31, %v5110_v56 }
 0x6f0   :  { %v1304_v34 = vpack.c.bf16 %v1300_v33, %v1298_v32 }
 0x6f2   :  { %4362 = vmatmul.mubr.msk.bf16.vlgmr.msra.gmra.mrb[8].mxu0 %vm1212_vm12, %v1304_v34 }
 0x6f3   :  { %4377 = vmatprep.mubr.msk.bf16.mxu0 %vm4718_vm0, %v4717_v2 }
 0x7ad   :  { %v1342_v24 = vpop.f32.mrb[20].mxu1 }
 0x7ae   :  { %v4345_v30 = vpop.f32.mrb[21].mxu1 }
 0x7af   :  { %v1345_v1 = vpop.f32.mrb[22].mxu1  ;;  %v4566_v30 = vld [vmem:[%s5662_s4] sm:$0xff]  }
 0x7b0   :  { %v4346_v38 = vpop.f32.mrb[23].mxu1  ;;  %4366 = vmatpush3.bf16.msra.mxu1 %v4566_v30 }
 0x7b1   :  { %4367 = vmatprep.subr.bf16.mxu1 %v4717_v2 }
 0x7b5   :  { %v1386_v40 = vpop.f32.mrb[4].mxu0 }
 0x7b6   :  { %v4351_v41 = vpop.f32.mrb[5].mxu0 }
 0x7b7   :  { %v1389_v42 = vpop.f32.mrb[6].mxu0 }
 0x7b8   :  { %v4352_v43 = vpop.f32.mrb[7].mxu0 }
 0x7bd   :  { %v1430_v44 = vpop.f32.mrb[24].mxu1 }
 0x7be   :  { %v1481_v45 = vcombine.low %v1342_v24, %v1430_v44  ;;  %v1482_v46 = vcombine.high %v1342_v24, %v1430_v44  ;;  %v4357_v48 = vpop.f32.mrb[25].mxu1 }
 0x7bf   :  { %v1433_v47 = vpop.f32.mrb[26].mxu1 }
 0x7c0   :  { %v1549_v56 = vcombine.low %v1345_v1, %v1433_v47  ;;  %v1550_v49 = vcombine.high %v1345_v1, %v1433_v47  ;;  %v4358_v50 = vpop.f32.mrb[27].mxu1  ;;  %v1489_v27 = vrot.slane %v1481_v45, %v4944_v20  ;;  %v1496_v55 = vrot.slane %v1482_v46, %v4944_v20 }
 0x7c2   :  { %v1557_v6 = vrot.slane %v1549_v56, %v4944_v20  ;;  %v1564_v14 = vrot.slane %v1550_v49, %v4944_v20 }
 0x7c5   :  { %v1474_v51 = vpop.f32.mrb[8].mxu0 }
 0x7c6   :  { %v1497_v52 = vcombine.low %v1386_v40, %v1474_v51  ;;  %v1498_v53 = vcombine.high %v1386_v40, %v1474_v51  ;;  %v4363_v54 = vpop.f32.mrb[9].mxu0 }
 0x7c7   :  { %v1477_v57 = vpop.f32.mrb[10].mxu0 }
 0x7c8   :  { %v1505_v58 = vrot.slane %v1497_v52, %v4944_v20  ;;  %v1512_v59 = vrot.slane %v1498_v53, %v4944_v20  ;;  %v1565_v37 = vcombine.low %v1389_v42, %v1477_v57  ;;  %v1566_v11 = vcombine.high %v1389_v42, %v1477_v57  ;;  %v4364_v62 = vpop.f32.mrb[11].mxu0  ;;  %v4567_v53 = vld [vmem:[%s5662_s4 + $0x8] sm:$0xff]  }
 0x7c9   :  { %4368 = vmatpush3.bf16.msra.mxu1 %v4567_v53  ;;  %v4568_v53 = vld [vmem:[%s5664_s6] sm:$0xff]  }
 0x7ca   :  { %v1513_v63 = vcombine.low %v1489_v27, %v1505_v58  ;;  %v1514_v3 = vcombine.high %v1489_v27, %v1505_v58  ;;  %v1529_v4 = vcombine.low %v1496_v55, %v1512_v59  ;;  %v1530_v5 = vcombine.high %v1496_v55, %v1512_v59  ;;  %4381 = vmatprep.subr.bf16.mxu1 %v4717_v2 }
 0x7cb   :  { %v1573_v8 = vrot.slane %v1565_v37, %v4944_v20  ;;  %v1580_v10 = vrot.slane %v1566_v11, %v4944_v20  ;;  %4374 = vmatpush3.bf16.msra.mxu0 %v4568_v53 }
 0x7cc   :  { %v1521_v13 = vrot.slane %v1513_v63, %v4948_v26  ;;  %v1528_v15 = vrot.slane %v1514_v3, %v4948_v26  ;;  %v1537_v16 = vrot.slane %v1529_v4, %v4948_v26  ;;  %v1544_v17 = vrot.slane %v1530_v5, %v4948_v26  ;;  %4375 = vmatprep.subr.bf16.mxu0 %v4717_v2 }
 0x7cd   :  { %v1581_v19 = vcombine.low %v1557_v6, %v1573_v8  ;;  %v1582_v36 = vcombine.high %v1557_v6, %v1573_v8  ;;  %v1597_v61 = vcombine.low %v1564_v14, %v1580_v10  ;;  %v1598_v21 = vcombine.high %v1564_v14, %v1580_v10 }
 0x7ce   :  { %v1617_v23 = vcombine.low %v1521_v13, %v1528_v15  ;;  %v4094_v25 = vcombine.high %v1521_v13, %v1528_v15  ;;  %v1633_v12 = vcombine.low %v1537_v16, %v1544_v17  ;;  %v4095_v28 = vcombine.high %v1537_v16, %v1544_v17 }
 0x7cf   :  { %v1589_v7 = vrot.slane %v1581_v19, %v4948_v26  ;;  %v1596_v9 = vrot.slane %v1582_v36, %v4948_v26  ;;  %v1605_v29 = vrot.slane %v1597_v61, %v4948_v26  ;;  %v1612_v31 = vrot.slane %v1598_v21, %v4948_v26 }
 0x7d0   :  { %v1624_v32 = vrot.slane %v1617_v23, %v4944_v20  ;;  %v1632_v33 = vrot.slane %v4094_v25, %v4944_v20  ;;  %v1640_v34 = vrot.slane %v1633_v12, %v4944_v20  ;;  %v1648_v24 = vrot.slane %v4095_v28, %v4944_v20 }
 0x7d1   :  { %v1685_v1 = vcombine.low %v1589_v7, %v1596_v9  ;;  %v4096_v38 = vcombine.high %v1589_v7, %v1596_v9  ;;  %v1701_v40 = vcombine.low %v1605_v29, %v1612_v31  ;;  %v4097_v41 = vcombine.high %v1605_v29, %v1612_v31 }
 0x7d2   :  { %v1650_v42 = vcombine.high %v1624_v32, %v1632_v33  ;;  %v1666_v43 = vcombine.high %v1640_v34, %v1648_v24  ;;  %v1649_v44 = vcombine.low %v1624_v32, %v1632_v33  ;;  %v1665_v45 = vcombine.low %v1640_v34, %v1648_v24  ;;  %v4098_v34 = vld [vmem:[%s5663_s5] ss:$0 sm:$0xff] }
 0x7d3   :  { %v1692_v46 = vrot.slane %v1685_v1, %v4944_v20  ;;  %v1700_v48 = vrot.slane %v4096_v38, %v4944_v20  ;;  %v1708_v47 = vrot.slane %v1701_v40, %v4944_v20  ;;  %v1716_v56 = vrot.slane %v4097_v41, %v4944_v20 }
 0x7d4   :  { %v1664_v49 = vrot.slane %v1650_v42, %v4948_v26  ;;  %v1680_v50 = vrot.slane %v1666_v43, %v4948_v26  ;;  %v1657_v51 = vrot.slane %v1649_v44, %v4948_v26  ;;  %v1673_v52 = vrot.slane %v1665_v45, %v4948_v26 }
 0x7d5   :  { %v1718_v54 = vcombine.high %v1692_v46, %v1700_v48  ;;  %v1734_v27 = vcombine.high %v1708_v47, %v1716_v56  ;;  %v1717_v55 = vcombine.low %v1692_v46, %v1700_v48  ;;  %v1733_v57 = vcombine.low %v1708_v47, %v1716_v56 }
 0x7d6   :  { %v1683_v58 = vcombine.low %v1664_v49, %v1680_v50  ;;  %v1681_v59 = vcombine.low %v1657_v51, %v1673_v52  ;;  %v1682_v37 = vcombine.high %v1657_v51, %v1673_v52  ;;  %v1684_v11 = vcombine.high %v1664_v49, %v1680_v50 }
 0x7d7   :  { %v1732_v62 = vrot.slane %v1718_v54, %v4948_v26  ;;  %v1748_v63 = vrot.slane %v1734_v27, %v4948_v26  ;;  %v1725_v3 = vrot.slane %v1717_v55, %v4948_v26  ;;  %v1741_v4 = vrot.slane %v1733_v57, %v4948_v26  ;;  %v4569_v54 = vld [vmem:[%s5664_s6 + $0x8] sm:$0xff]  }
 0x7d8   :  { %4376 = vmatpush3.bf16.msra.mxu0 %v4569_v54 }
 0x7d9   :  { %v1751_v5 = vcombine.low %v1732_v62, %v1748_v63  ;;  %v1750_v6 = vcombine.high %v1725_v3, %v1741_v4  ;;  %v1749_v14 = vcombine.low %v1725_v3, %v1741_v4  ;;  %v1752_v8 = vcombine.high %v1732_v62, %v1748_v63  ;;  %4401 = vmatprep.subr.bf16.mxu0 %v4717_v2  ;;  %v4102_v63 = vld [vmem:[%s5670_s12] ss:$0 sm:$0xff] }
 0x7db   :  { %v4531_v10 = vpack.i.bf16 %v1751_v5, %v1683_v58  ;;  %v4526_v13 = vpack.i.bf16 %v1750_v6, %v1682_v37  ;;  %v4536_v15 = vpack.i.bf16 %v1752_v8, %v1684_v11  ;;  %v4103_v6 = vld [vmem:[%s5671_s13] ss:$0 sm:$0xff] }
 0x7dd   :  { %4532 = vrot.lane.b32.xlu1 %v4531_v10, %s5682_s28  ;;  %4527 = vrot.lane.b32.xlu0 %v4526_v13, %s5680_s2 }
 0x7e1   :  { %4537 = vrot.lane.b32.xlu1 %v4536_v15, %s5679_s29  ;;  %v4570_v15 = vld [vmem:[%s5666_s8] sm:$0xff]  }
 0x84f   :  { %v4533_v16 = vpop.permute.xlu1 %4532  ;;  %v4528_v17 = vpop.permute.xlu0 %4527 }
 0x850   :  { %v4530_v19 = vunpack.i.h.bf16 %v4528_v17  ;;  %v4529_v36 = vunpack.i.l.bf16 %v4528_v17  ;;  %v4535_v61 = vunpack.i.h.bf16 %v4533_v16  ;;  %v4534_v21 = vunpack.i.l.bf16 %v4533_v16  ;;  %v4571_v16 = vld [vmem:[%s5666_s8 + $0x8] sm:$0xff]   ;;  %v4572_v17 = vld [vmem:[%s5666_s8 + $0x10] sm:$0xff]  }
 0x852   :  { %v1777_v23 = vsel %vm248_vm5, %v1681_v59, %v4529_v36  ;;  %v1778_v25 = vsel %vm248_vm5, %v1749_v14, %v4530_v19  ;;  %v4573_v19 = vld [vmem:[%s5666_s8 + $0x18] sm:$0xff]   ;;  %v4574_v36 = vld [vmem:[%s5666_s8 + $0x20] sm:$0xff]  }
 0x853   :  { %v4538_v12 = vpop.permute.xlu1 %4537  ;;  %v1779_v9 = vsel %vm1212_vm12, %v1777_v23, %v4534_v21  ;;  %v1780_v29 = vsel %vm1212_vm12, %v1778_v25, %v4535_v61  ;;  %v4575_v61 = vld [vmem:[%s5666_s8 + $0x28] sm:$0xff]   ;;  %v4576_v21 = vld [vmem:[%s5666_s8 + $0x30] sm:$0xff]   ;;  %v4577_v23 = vld [vmem:[%s5666_s8 + $0x38] sm:$0xff]  }
 0x854   :  { %v4540_v28 = vunpack.i.h.bf16 %v4538_v12  ;;  %v4539_v7 = vunpack.i.l.bf16 %v4538_v12  ;;  %v4104_v25 = vld [vmem:[%s5665_s7] ss:$0 sm:$0xff] }
 0x856   :  { %v1782_v31 = vsel %vm1781_vm13, %v1779_v9, %v4539_v7  ;;  %v1783_v32 = vsel %vm1781_vm13, %v1780_v29, %v4540_v28 }
 0x857   :  { %v1784_v33 = vpack.c.bf16 %v1783_v32, %v1782_v31 }
 0x859   :  { %4370 = vmatmul.mubr.msk.bf16.vlgmr.msra.gmra.mrb[28].mxu1 %vm185_vm4, %v1784_v33 }
 0x85a   :  { %4397 = vmatprep.mubr.msk.bf16.mxu1 %vm4718_vm0, %v4717_v2  ;;  %4382 = vmatpush3.bf16.msra.mxu1 %v4570_v15 }
 0x85b   :  { %4383 = vmatprep.subr.bf16.mxu1 %v4717_v2 }
 0x85e   :  { %4384 = vmatpush3.bf16.msra.mxu1 %v4571_v16 }
 0x85f   :  { %4385 = vmatprep.subr.bf16.mxu1 %v4717_v2 }
 0x862   :  { %4386 = vmatpush3.bf16.msra.mxu1 %v4572_v17 }
 0x863   :  { %4387 = vmatprep.subr.bf16.mxu1 %v4717_v2 }
 0x866   :  { %4388 = vmatpush3.bf16.msra.mxu1 %v4573_v19 }
 0x867   :  { %4389 = vmatprep.subr.bf16.mxu1 %v4717_v2 }
 0x86a   :  { %4390 = vmatpush3.bf16.msra.mxu1 %v4574_v36 }
 0x86b   :  { %4391 = vmatprep.subr.bf16.mxu1 %v4717_v2 }
 0x86e   :  { %4392 = vmatpush3.bf16.msra.mxu1 %v4575_v61 }
 0x86f   :  { %4393 = vmatprep.subr.bf16.mxu1 %v4717_v2 }
 0x872   :  { %4394 = vmatpush3.bf16.msra.mxu1 %v4576_v21 }
 0x873   :  { %4395 = vmatprep.subr.bf16.mxu1 %v4717_v2 }
 0x876   :  { %4396 = vmatpush3.bf16.msra.mxu1 %v4577_v23  ;;  %v4119_v23 = vld [vmem:[%s5668_s10 + $0x1] ss:$0 sm:$0xff]  ;;  %s5693_s10 = smov 56  }
 0x877   :  { %4427 = vmatprep.subr.bf16.mxu1 %v4717_v2 }
 0x92c   :  { %v1845_v24 = vpop.f32.mrb[28].mxu1 }
 0x92d   :  { %v1846_v30 = vadd.f32 %v4098_v34, %v1845_v24  ;;  %v4371_v1 = vpop.f32.mrb[29].mxu1 }
 0x92e   :  { %v1848_v38 = vpop.f32.mrb[30].mxu1 }
 0x92f   :  { %v5215_v40 = vadd.f32 %v1846_v30, %v4893_v35  ;;  %v1849_v41 = vadd.f32 %v4098_v34, %v1848_v38  ;;  %v4372_v42 = vpop.f32.mrb[31].mxu1 }
 0x931   :  { %v5218_v43 = vadd.f32 %v1849_v41, %v4897_v39  ;;  %v1856_v44 = vsel %vm185_vm4, %v5215_v40, 0.0 }
 0x932   :  { %1857 = vadd.xlane.f32.xlu0 %v1856_v44 }
 0x933   :  { %v1859_v45 = vsel %vm185_vm4, %v5218_v43, 0.0 }
 0x934   :  { %1860 = vadd.xlane.f32.xlu1 %v1859_v45 }
 0x9bf   :  { %v1858_v46 = vpop.xlane.xlu0 %1857 }
 0x9c0   :  { %v1862_v48 = vmul.f32 0.03125, %v1858_v46 }
 0x9c1   :  { %v1861_v47 = vpop.xlane.xlu1 %1860 }
 0x9c2   :  { %v1864_v56 = vsub.f32 %v5215_v40, %v1862_v48  ;;  %v1863_v35 = vmul.f32 0.03125, %v1861_v47 }
 0x9c4   :  { %v1865_v49 = vsub.f32 %v5218_v43, %v1863_v35  ;;  %v1866_v50 = vmul.f32 %v1864_v56, %v1864_v56 }
 0x9c6   :  { %v1868_v39 = vsel %vm185_vm4, %v1866_v50, 0.0  ;;  %v1867_v51 = vmul.f32 %v1865_v49, %v1865_v49 }
 0x9c7   :  { %1869 = vadd.xlane.f32.xlu0 %v1868_v39 }
 0x9c8   :  { %v1871_v52 = vsel %vm185_vm4, %v1867_v51, 0.0  ;;  %v4108_v51 = vld [vmem:[%s5667_s9] ss:$0 sm:$0xff] }
 0x9cb   :  { %1872 = vadd.xlane.f32.xlu0 %v1871_v52 }
 0xa54   :  { %v1870_v27 = vpop.xlane.xlu0 %1869 }
 0xa55   :  { %v1874_v55 = vmul.f32 0.03125, %v1870_v27 }
 0xa57   :  { %v1876_v57 = vadd.f32 1e-05, %v1874_v55 }
 0xa58   :  { %v1873_v58 = vpop.xlane.xlu0 %1872 }
 0xa59   :  { %4636 = vrsqrt.f32 %v1876_v57  ;;  %v1875_v59 = vmul.f32 0.03125, %v1873_v58 }
 0xa5b   :  { %v1877_v37 = vadd.f32 1e-05, %v1875_v59 }
 0xa5d   :  { %4638 = vrsqrt.f32 %v1877_v37 }
 0xa63   :  { %v4637_v11 = vpop.eup %4636 }
 0xa64   :  { %v1880_v62 = vmul.f32 %v4637_v11, %v1864_v56 }
 0xa66   :  { %v1888_v4 = vmul.f32 %v4102_v63, %v1880_v62 }
 0xa67   :  { %v4639_v3 = vpop.eup %4638 }
 0xa68   :  { %v1881_v5 = vmul.f32 %v4639_v3, %v1865_v49  ;;  %v1896_v8 = vadd.f32 %v4103_v6, %v1888_v4 }
 0xa6a   :  { %v1889_v14 = vmul.f32 %v4102_v63, %v1881_v5 }
 0xa6c   :  { %v1897_v10 = vadd.f32 %v4103_v6, %v1889_v14 }
 0xa6e   :  { %v1898_v13 = vpack.c.bf16 %v1897_v10, %v1896_v8  ;;  %v4578_v10 = vld [vmem:[%s5661_s3 + $0x10] sm:$0xff]  }
 0xa70   :  { %4378 = vmatmul.mubr.msk.bf16.vlgmr.msra.gmra.mrb[12].mxu0 %vm185_vm4, %v1898_v13  ;;  %v4579_v13 = vld [vmem:[%s5661_s3 + $0x18] sm:$0xff]  }
 0xa71   :  { %4405 = vmatprep.mubr.msk.bf16.mxu0 %vm4718_vm0, %v4717_v2  ;;  %4402 = vmatpush3.bf16.msra.mxu0 %v4578_v10 }
 0xa72   :  { %4403 = vmatprep.subr.bf16.mxu0 %v4717_v2 }
 0xa75   :  { %4404 = vmatpush3.bf16.msra.mxu0 %v4579_v13 }
 0xa76   :  { %4409 = vmatprep.subr.bf16.mxu0 %v4717_v2 }
 0xb43   :  { %v1959_v12 = vpop.f32.mrb[12].mxu0 }
 0xb44   :  { %v1960_v28 = vadd.f32 %v4104_v25, %v1959_v12  ;;  %v4379_v7 = vpop.f32.mrb[13].mxu0 }
 0xb45   :  { %v1962_v9 = vpop.f32.mrb[14].mxu0 }
 0xb46   :  { %v1968_v29 = vmul.f32 0.044715, %v1960_v28  ;;  %v1963_v31 = vadd.f32 %v4104_v25, %v1962_v9  ;;  %v4380_v32 = vpop.f32.mrb[15].mxu0  ;;  %v1966_v47 = vmul.f32 0.5, %v1960_v28  ;;  %v4120_v9 = vld [vmem:[%s5669_s11 + $0x1] ss:$0 sm:$0xff] }
 0xb47   :  { %s5694_s11 = smov 64  }
 0xb48   :  { %v1970_v33 = vmul.f32 %v1968_v29, %v1960_v28  ;;  %v1969_v34 = vmul.f32 0.044715, %v1963_v31  ;;  %v1967_v56 = vmul.f32 0.5, %v1963_v31 }
 0xb4a   :  { %v1972_v24 = vmul.f32 %v1970_v33, %v1960_v28  ;;  %v1971_v30 = vmul.f32 %v1969_v34, %v1963_v31 }
 0xb4c   :  { %v1974_v1 = vadd.f32 %v1972_v24, %v1960_v28  ;;  %v1973_v38 = vmul.f32 %v1971_v30, %v1963_v31 }
 0xb4e   :  { %v1976_v41 = vmul.f32 0.7978846, %v1974_v1  ;;  %v1975_v42 = vadd.f32 %v1973_v38, %v1963_v31 }
 0xb50   :  { %4640 = vtanh.f32 %v1976_v41  ;;  %v1977_v44 = vmul.f32 0.7978846, %v1975_v42 }
 0xb52   :  { %4642 = vtanh.f32 %v1977_v44 }
 0xb5a   :  { %v4641_v45 = vpop.eup %4640 }
 0xb5b   :  { %v1980_v46 = vadd.f32 1.0, %v4641_v45 }
 0xb5c   :  { %v4643_v48 = vpop.eup %4642 }
 0xb5d   :  { %v1981_v35 = vadd.f32 1.0, %v4643_v48  ;;  %v1982_v49 = vmul.f32 %v1980_v46, %v1966_v47 }
 0xb5f   :  { %v1983_v50 = vmul.f32 %v1981_v35, %v1967_v56 }
 0xb61   :  { %v1984_v39 = vpack.c.bf16 %v1983_v50, %v1982_v49 }
 0xb63   :  { %4398 = vmatmul.mubr.bf16.vlgmr.msra.gmra.mrb[32].mxu1 %v1984_v39 }
 0xb64   :  { %4429 = vmatprep.mubr.msk.bf16.mxu1 %vm4718_vm0, %v4717_v2 }
 0xc36   :  { %v2090_v52 = vpop.f32.mrb[32].mxu1 }
 0xc37   :  { %v2091_v53 = vadd.f32 %v4108_v51, %v2090_v52  ;;  %v4399_v54 = vpop.f32.mrb[33].mxu1 }
 0xc38   :  { %v2093_v27 = vpop.f32.mrb[34].mxu1 }
 0xc39   :  { %v5286_v55 = vadd.f32 %v2091_v53, %v5215_v40  ;;  %v2094_v57 = vadd.f32 %v4108_v51, %v2093_v27  ;;  %v4400_v58 = vpop.f32.mrb[35].mxu1 }
 0xc3b   :  { %v5289_v59 = vadd.f32 %v2094_v57, %v5218_v43  ;;  %v2103_v37 = vsel %vm185_vm4, %v5286_v55, 0.0 }
 0xc3c   :  { %2104 = vadd.xlane.f32.xlu1 %v2103_v37 }
 0xc3d   :  { %v2106_v11 = vsel %vm185_vm4, %v5289_v59, 0.0 }
 0xc3e   :  { %2107 = vadd.xlane.f32.xlu0 %v2106_v11 }
 0xcc9   :  { %v2105_v62 = vpop.xlane.xlu1 %2104 }
 0xcca   :  { %v2109_v63 = vmul.f32 0.03125, %v2105_v62 }
 0xccb   :  { %v2108_v3 = vpop.xlane.xlu0 %2107 }
 0xccc   :  { %v2111_v4 = vsub.f32 %v5286_v55, %v2109_v63  ;;  %v2110_v40 = vmul.f32 0.03125, %v2108_v3 }
 0xcce   :  { %v2112_v5 = vsub.f32 %v5289_v59, %v2110_v40  ;;  %v2113_v6 = vmul.f32 %v2111_v4, %v2111_v4 }
 0xcd0   :  { %v2115_v43 = vsel %vm185_vm4, %v2113_v6, 0.0  ;;  %v2114_v14 = vmul.f32 %v2112_v5, %v2112_v5 }
 0xcd1   :  { %2116 = vadd.xlane.f32.xlu1 %v2115_v43 }
 0xcd2   :  { %v2118_v8 = vsel %vm185_vm4, %v2114_v14, 0.0 }
 0xcd3   :  { %2119 = vadd.xlane.f32.xlu0 %v2118_v8 }
 0xd5e   :  { %v2117_v15 = vpop.xlane.xlu1 %2116 }
 0xd5f   :  { %v2121_v16 = vmul.f32 0.03125, %v2117_v15 }
 0xd60   :  { %v2120_v17 = vpop.xlane.xlu0 %2119 }
 0xd61   :  { %v2123_v19 = vadd.f32 1e-05, %v2121_v16  ;;  %v2122_v36 = vmul.f32 0.03125, %v2120_v17 }
 0xd63   :  { %4644 = vrsqrt.f32 %v2123_v19  ;;  %v2124_v61 = vadd.f32 1e-05, %v2122_v36 }
 0xd65   :  { %4646 = vrsqrt.f32 %v2124_v61 }
 0xd6d   :  { %v4645_v21 = vpop.eup %4644 }
 0xd6e   :  { %v2127_v25 = vmul.f32 %v4645_v21, %v2111_v4 }
 0xd6f   :  { %v4647_v12 = vpop.eup %4646 }
 0xd70   :  { %v2135_v28 = vmul.f32 %v4119_v23, %v2127_v25  ;;  %v2128_v7 = vmul.f32 %v4647_v12, %v2112_v5 }
 0xd72   :  { %v2136_v29 = vmul.f32 %v4119_v23, %v2128_v7  ;;  %v2143_v31 = vadd.f32 %v4120_v9, %v2135_v28 }
 0xd74   :  { %v2144_v32 = vadd.f32 %v4120_v9, %v2136_v29 }
 0xd76   :  { %v2145_v33 = vpack.c.bf16 %v2144_v32, %v2143_v31 }
 0xd78   :  { %4406 = vmatmul.mubr.msk.bf16.vlgmr.msra.gmra.mrb[16].mxu0 %vm185_vm4, %v2145_v33 }
 0xd79   :  { %4411 = vmatprep.mubr.msk.bf16.mxu0 %vm4718_vm0, %v4717_v2 }
 0xe4b   :  { %v2200_v34 = vpop.f32.mrb[16].mxu0 }
 0xe4c   :  { %v4407_v24 = vpop.f32.mrb[17].mxu0 }
 0xe4d   :  { %v2203_v30 = vpop.f32.mrb[18].mxu0 }
 0xe4e   :  { %v5316_v1 = vpack.c.bf16 %v2203_v30, %v2200_v34  ;;  %v4408_v38 = vpop.f32.mrb[19].mxu0 }
 0xe50   :  { %2211 = vrot.lane.b32.xlu0 %v5316_v1, %s4720_s30  ;;  %2209 = vrot.lane.b32.xlu1 %v5316_v1, %s4721_s0  ;;  %v2235_v39 = vshrl.u32 %v5316_v1, 16  ;;  %s5695_s30 = smov 48   ;;  %s5696_s0 = smov 40  }
 0xe54   :  { %2217 = vrot.lane.b32.xlu0 %v5316_v1, %s4724_s19  ;;  %2213 = vrot.lane.b32.xlu1 %v5316_v1, %s4722_s1 }
 0xe58   :  { %2221 = vrot.lane.b32.xlu0 %v5316_v1, %s4726_s22  ;;  %2215 = vrot.lane.b32.xlu1 %v5316_v1, %s4723_s20  ;;  %s5698_s22 = smov 8  }
 0xe5c   :  { %2219 = vrot.lane.b32.xlu1 %v5316_v1, %s4725_s21 }
 0xec2   :  { %v2212_v41 = vpop.permute.xlu0 %2211  ;;  %v2210_v42 = vpop.permute.xlu1 %2209 }
 0xec3   :  { %v2233_v56 = vpack.i.b16 %v2210_v42, %v5316_v1  ;;  %v2236_v35 = vshrl.u32 %v2210_v42, 16  ;;  %v2243_v53 = vshrl.u32 %v2212_v41, 16 }
 0xec5   :  { %v2237_v63 = vpack.i.b16 %v2236_v35, %v2235_v39 }
 0xec6   :  { %v2214_v44 = vpop.permute.xlu1 %2213  ;;  %v2218_v45 = vpop.permute.xlu0 %2217 }
 0xec7   :  { %v2252_v49 = vshrl.u32 %v2218_v45, 16  ;;  %v2244_v51 = vshrl.u32 %v2214_v44, 16  ;;  %v2241_v58 = vpack.i.b16 %v2214_v44, %v2212_v41 }
 0xec9   :  { %v2245_v3 = vpack.i.b16 %v2244_v51, %v2243_v53 }
 0xeca   :  { %v2216_v46 = vpop.permute.xlu1 %2215  ;;  %v2222_v50 = vpop.permute.xlu0 %2221 }
 0xecb   :  { %v2249_v48 = vpack.i.b16 %v2218_v45, %v2216_v46  ;;  %v2251_v47 = vshrl.u32 %v2216_v46, 16  ;;  %v2260_v37 = vshrl.u32 %v2222_v50, 16 }
 0xecd   :  { %v2253_v54 = vpack.i.b16 %v2252_v49, %v2251_v47  ;;  %v2279_v27 = vcombine.low %v2233_v56, %v2249_v48  ;;  %v2280_v57 = vcombine.high %v2233_v56, %v2249_v48 }
 0xece   :  { %v2220_v52 = vpop.permute.xlu1 %2219 }
 0xecf   :  { %v2257_v11 = vpack.i.b16 %v2222_v50, %v2220_v52  ;;  %v2259_v62 = vshrl.u32 %v2220_v52, 16  ;;  %v2287_v6 = vrot.slane %v2279_v27, %v4944_v20  ;;  %v2294_v43 = vrot.slane %v2280_v57, %v4944_v20 }
 0xed0   :  { %v2413_v14 = vcombine.low %v2237_v63, %v2253_v54  ;;  %v2414_v8 = vcombine.high %v2237_v63, %v2253_v54 }
 0xed1   :  { %v2261_v4 = vpack.i.b16 %v2260_v37, %v2259_v62  ;;  %v2295_v40 = vcombine.low %v2241_v58, %v2257_v11  ;;  %v2296_v5 = vcombine.high %v2241_v58, %v2257_v11 }
 0xed2   :  { %v2421_v21 = vrot.slane %v2413_v14, %v4944_v20  ;;  %v2428_v23 = vrot.slane %v2414_v8, %v4944_v20 }
 0xed3   :  { %v2303_v10 = vrot.slane %v2295_v40, %v4944_v20  ;;  %v2310_v13 = vrot.slane %v2296_v5, %v4944_v20  ;;  %v2429_v15 = vcombine.low %v2245_v3, %v2261_v4  ;;  %v2430_v16 = vcombine.high %v2245_v3, %v2261_v4 }
 0xed5   :  { %v2341_v17 = vcombine.low %v2287_v6, %v2303_v10  ;;  %v2342_v19 = vcombine.high %v2287_v6, %v2303_v10  ;;  %v2357_v36 = vcombine.low %v2294_v43, %v2310_v13  ;;  %v2358_v61 = vcombine.high %v2294_v43, %v2310_v13 }
 0xed6   :  { %v2437_v25 = vrot.slane %v2429_v15, %v4944_v20  ;;  %v2444_v12 = vrot.slane %v2430_v16, %v4944_v20 }
 0xed7   :  { %v2349_v28 = vrot.slane %v2341_v17, %v4948_v26  ;;  %v2356_v7 = vrot.slane %v2342_v19, %v4948_v26  ;;  %v2365_v9 = vrot.slane %v2357_v36, %v4948_v26  ;;  %v2372_v29 = vrot.slane %v2358_v61, %v4948_v26 }
 0xed8   :  { %v2475_v31 = vcombine.low %v2421_v21, %v2437_v25  ;;  %v2476_v32 = vcombine.high %v2421_v21, %v2437_v25  ;;  %v2491_v33 = vcombine.low %v2428_v23, %v2444_v12  ;;  %v2492_v34 = vcombine.high %v2428_v23, %v2444_v12 }
 0xed9   :  { %v4128_v24 = vcombine.low %v2349_v28, %v2356_v7  ;;  %v4130_v30 = vcombine.high %v2349_v28, %v2356_v7  ;;  %v4132_v38 = vcombine.low %v2365_v9, %v2372_v29  ;;  %v4134_v41 = vcombine.high %v2365_v9, %v2372_v29 }
 0xeda   :  { %v2483_v42 = vrot.slane %v2475_v31, %v4948_v26  ;;  %v2490_v44 = vrot.slane %v2476_v32, %v4948_v26  ;;  %v2499_v45 = vrot.slane %v2491_v33, %v4948_v26  ;;  %v2506_v46 = vrot.slane %v2492_v34, %v4948_v26 }
 0xedb   :  { %v2555_v48 = vrot.slane %v4128_v24, %v4944_v20  ;;  %v2571_v47 = vrot.slane %v4130_v30, %v4944_v20  ;;  %v2587_v56 = vrot.slane %v4132_v38, %v4944_v20  ;;  %v2603_v35 = vrot.slane %v4134_v41, %v4944_v20 }
 0xedc   :  { %v4136_v49 = vcombine.low %v2483_v42, %v2490_v44  ;;  %v4138_v50 = vcombine.high %v2483_v42, %v2490_v44  ;;  %v4140_v39 = vcombine.low %v2499_v45, %v2506_v46  ;;  %v4142_v51 = vcombine.high %v2499_v45, %v2506_v46 }
 0xedd   :  { %v2612_v52 = vcombine.high %v2555_v48, %v2571_v47  ;;  %v2636_v53 = vcombine.high %v2587_v56, %v2603_v35  ;;  %v2611_v40 = vcombine.low %v2555_v48, %v2571_v47  ;;  %v2635_v5 = vcombine.low %v2587_v56, %v2603_v35 }
 0xede   :  { %v2673_v54 = vrot.slane %v4136_v49, %v4944_v20  ;;  %v2689_v27 = vrot.slane %v4138_v50, %v4944_v20  ;;  %v2705_v57 = vrot.slane %v4140_v39, %v4944_v20  ;;  %v2721_v58 = vrot.slane %v4142_v51, %v4944_v20 }
 0xedf   :  { %v2626_v37 = vrot.slane %v2612_v52, %v4948_v26  ;;  %v2650_v11 = vrot.slane %v2636_v53, %v4948_v26  ;;  %v2619_v17 = vrot.slane %v2611_v40, %v4948_v26  ;;  %v2643_v21 = vrot.slane %v2635_v5, %v4948_v26 }
 0xee0   :  { %v2729_v62 = vcombine.low %v2673_v54, %v2689_v27  ;;  %v2730_v63 = vcombine.high %v2673_v54, %v2689_v27  ;;  %v2753_v3 = vcombine.low %v2705_v57, %v2721_v58  ;;  %v2754_v4 = vcombine.high %v2705_v57, %v2721_v58 }
 0xee1   :  { %v2662_v14 = vcombine.high %v2626_v37, %v2650_v11  ;;  %v2661_v8 = vcombine.low %v2626_v37, %v2650_v11  ;;  %v2660_v31 = vcombine.high %v2619_v17, %v2643_v21  ;;  %v2659_v32 = vcombine.low %v2619_v17, %v2643_v21 }
 0xee2   :  { %v2744_v6 = vrot.slane %v2730_v63, %v4948_v26  ;;  %v2768_v43 = vrot.slane %v2754_v4, %v4948_v26  ;;  %v2737_v15 = vrot.slane %v2729_v62, %v4948_v26  ;;  %v2761_v16 = vrot.slane %v2753_v3, %v4948_v26 }
 0xee3   :  { %v2804_v36 = vshrl.u32 %v2662_v14, 16  ;;  %v2798_v29 = vshrl.u32 %v2661_v8, 16  ;;  %v2792_v30 = vshrl.u32 %v2660_v31, 16  ;;  %v2786_v44 = vshrl.u32 %v2659_v32, 16 }
 0xee4   :  { %v2779_v10 = vcombine.low %v2744_v6, %v2768_v43  ;;  %v2780_v13 = vcombine.high %v2744_v6, %v2768_v43  ;;  %v2778_v28 = vcombine.high %v2737_v15, %v2761_v16  ;;  %v2777_v9 = vcombine.low %v2737_v15, %v2761_v16 }
 0xee6   :  { %v2797_v19 = vpack.i.b16 %v2779_v10, %v2661_v8  ;;  %v2805_v61 = vshrl.u32 %v2780_v13, 16  ;;  %v2799_v12 = vshrl.u32 %v2779_v10, 16  ;;  %v2793_v34 = vshrl.u32 %v2778_v28, 16 }
 0xee7   :  { %v2785_v24 = vpack.i.b16 %v2777_v9, %v2659_v32  ;;  %v2787_v42 = vshrl.u32 %v2777_v9, 16  ;;  %v2803_v45 = vpack.i.b16 %v2780_v13, %v2662_v14  ;;  %v2791_v47 = vpack.i.b16 %v2778_v28, %v2660_v31 }
 0xee8   :  { %v2827_v23 = vsel %vm248_vm5, %v2797_v19, 0  ;;  %v2806_v25 = vpack.i.b16 %v2805_v61, %v2804_v36  ;;  %v2800_v33 = vpack.i.b16 %v2799_v12, %v2798_v29  ;;  %v2794_v41 = vpack.i.b16 %v2793_v34, %v2792_v30 }
 0xee9   :  { %4410 = vmatpush3.bf16.xpose.msra.mxu0 %v2827_v23  ;;  %v2788_v46 = vpack.i.b16 %v2787_v42, %v2786_v44  ;;  %v2921_v48 = vsel %vm248_vm5, %v2803_v45, 0 }
 0xeea   :  { %v2968_v7 = vsel %vm248_vm5, %v2806_v25, 0  ;;  %4415 = vmatprep.subr.bf16.mxu0 %v4717_v2  ;;  %v2874_v38 = vsel %vm248_vm5, %v2800_v33, 0 }
 0xeeb   :  { %4428 = vmatpush3.bf16.xpose.msra.mxu1 %v2968_v7 }
 0xeec   :  { %4439 = vmatprep.subr.bf16.mxu1 %v4717_v2 }
 0xef0   :  { %4412 = vmatmul.mubr.msk.bf16.vlgmr.msra.gmra.mrb[20].mxu0 %vm248_vm5, %v2785_v24 }
 0xef1   :  { %4416 = vmatpush3.bf16.xpose.msra.mxu0 %v2874_v38  ;;  %4417 = vmatprep.mubr.msk.bf16.mxu0 %vm4718_vm0, %v4717_v2 }
 0xef2   :  { %4430 = vmatmul.mubr.msk.bf16.vlgmr.msra.gmra.mrb[36].mxu1 %vm248_vm5, %v2794_v41  ;;  %4421 = vmatprep.subr.bf16.mxu0 %v4717_v2 }
 0xef3   :  { %4441 = vmatprep.mubr.msk.bf16.mxu1 %vm4718_vm0, %v4717_v2 }
 0xef8   :  { %4418 = vmatmul.mubr.msk.bf16.vlgmr.msra.gmra.mrb[24].mxu0 %vm248_vm5, %v2788_v46 }
 0xef9   :  { %4422 = vmatpush3.bf16.xpose.msra.mxu0 %v2921_v48  ;;  %4423 = vmatprep.mubr.msk.bf16.mxu0 %vm4718_vm0, %v4717_v2 }
 0xefa   :  { %4433 = vmatprep.subr.bf16.mxu0 %v4717_v2 }
 0xf00   :  { %4424 = vmatmul.mubr.msk.bf16.vlgmr.msra.gmra.mrb[28].mxu0 %vm248_vm5, %v2791_v47 }
 0xf01   :  { %4435 = vmatprep.mubr.msk.bf16.mxu0 %vm4718_vm0, %v4717_v2 }
 0xfc3   :  { %v2863_v56 = vpop.f32.mrb[20].mxu0 }
 0xfc4   :  { %v3011_v35 = vmul.f32 0.35355338, %v2863_v56  ;;  %v4413_v49 = vpop.f32.mrb[21].mxu0 }
 0xfc5   :  { %v2866_v50 = vpop.f32.mrb[22].mxu0  ;;  %v3004_v39 = vpop.f32.mrb[36].mxu1 }
 0xfc6   :  { %v3012_v51 = vmul.f32 0.35355338, %v2866_v50  ;;  %v4414_v52 = vpop.f32.mrb[23].mxu0  ;;  %v4431_v53 = vpop.f32.mrb[37].mxu1  ;;  %v3019_v54 = vadd.f32 %v3011_v35, %v5039_v60  ;;  %v3017_v13 = vmul.f32 0.35355338, %v3004_v39 }
 0xfc7   :  { %v3007_v27 = vpop.f32.mrb[38].mxu1 }
 0xfc8   :  { %v4432_v57 = vpop.f32.mrb[39].mxu1  ;;  %v3027_v58 = vsel %vm1212_vm12, %v3019_v54, -inf  ;;  %v3020_v37 = vadd.f32 %v3012_v51, %v5041_v0  ;;  %v3018_v19 = vmul.f32 0.35355338, %v3007_v27  ;;  %v3025_v12 = vadd.f32 %v3017_v13, %v5039_v60 }
 0xfc9   :  { %3028 = vmax.xlane.f32.xlu1 %v3027_v58 }
 0xfca   :  { %v3030_v11 = vsel %vm1212_vm12, %v3020_v37, -inf  ;;  %v3026_v7 = vadd.f32 %v3018_v19, %v5041_v0  ;;  %v3045_v9 = vsel %vm1212_vm12, %v3025_v12, -inf }
 0xfcb   :  { %3031 = vmax.xlane.f32.xlu0 %v3030_v11  ;;  %v2910_v62 = vpop.f32.mrb[24].mxu0 }
 0xfcc   :  { %v3013_v63 = vmul.f32 0.35355338, %v2910_v62  ;;  %v4419_v3 = vpop.f32.mrb[25].mxu0  ;;  %v3048_v29 = vsel %vm1212_vm12, %v3026_v7, -inf }
 0xfcd   :  { %v2913_v4 = vpop.f32.mrb[26].mxu0 }
 0xfce   :  { %v3014_v40 = vmul.f32 0.35355338, %v2913_v4  ;;  %v4420_v5 = vpop.f32.mrb[27].mxu0  ;;  %v3021_v6 = vadd.f32 %v3013_v63, %v5039_v60 }
 0xfd0   :  { %v3033_v43 = vsel %vm1212_vm12, %v3021_v6, -inf  ;;  %v3022_v14 = vadd.f32 %v3014_v40, %v5041_v0 }
 0xfd1   :  { %3034 = vmax.xlane.f32.xlu0 %v3033_v43 }
 0xfd2   :  { %v3036_v8 = vsel %vm1212_vm12, %v3022_v14, -inf }
 0xfd3   :  { %3037 = vmax.xlane.f32.xlu1 %v3036_v8  ;;  %v2957_v10 = vpop.f32.mrb[28].mxu0 }
 0xfd4   :  { %v3015_v15 = vmul.f32 0.35355338, %v2957_v10  ;;  %v4425_v16 = vpop.f32.mrb[29].mxu0 }
 0xfd5   :  { %v2960_v17 = vpop.f32.mrb[30].mxu0 }
 0xfd6   :  { %v3016_v36 = vmul.f32 0.35355338, %v2960_v17  ;;  %v4426_v61 = vpop.f32.mrb[31].mxu0  ;;  %v3023_v21 = vadd.f32 %v3015_v15, %v5039_v60 }
 0xfd8   :  { %v3039_v23 = vsel %vm1212_vm12, %v3023_v21, -inf  ;;  %v3024_v25 = vadd.f32 %v3016_v36, %v5041_v0 }
 0xfd9   :  { %3040 = vmax.xlane.f32.xlu0 %v3039_v23 }
 0xfda   :  { %v3042_v28 = vsel %vm1212_vm12, %v3024_v25, -inf }
 0xfdb   :  { %3043 = vmax.xlane.f32.xlu1 %v3042_v28 }
 0xfdd   :  { %3046 = vmax.xlane.f32.xlu0 %v3045_v9 }
 0xfdf   :  { %3049 = vmax.xlane.f32.xlu1 %v3048_v29 }
 0xff0   :  { %2225 = vrot.lane.b32.xlu1 %v5316_v1, %s5693_s10 }
 0xff3   :  { %2223 = vrot.lane.b32.xlu0 %v5316_v1, %s5694_s11 }
 0xff4   :  { %2227 = vrot.lane.b32.xlu1 %v5316_v1, %s5695_s30 }
 0xff7   :  { %2229 = vrot.lane.b32.xlu0 %v5316_v1, %s5696_s0 }
0x1056   :  { %v3029_v60 = vpop.xlane.xlu1 %3028 }
0x1057   :  { %v3051_v0 = vsub.f32 %v3019_v54, %v3029_v60 }
0x1058   :  { %v3032_v31 = vpop.xlane.xlu0 %3031 }
0x1059   :  { %v3059_v32 = vmul.f32 1.442695, %v3051_v0  ;;  %v3052_v33 = vsub.f32 %v3020_v37, %v3032_v31 }
0x105b   :  { %4648 = vpow2.f32 %v3059_v32  ;;  %v3061_v34 = vmul.f32 1.442695, %v3052_v33 }
0x105d   :  { %4650 = vpow2.f32 %v3061_v34 }
0x105e   :  { %v3035_v24 = vpop.xlane.xlu0 %3034 }
0x105f   :  { %v3053_v30 = vsub.f32 %v3021_v6, %v3035_v24 }
0x1060   :  { %v3038_v38 = vpop.xlane.xlu1 %3037 }
0x1061   :  { %v3063_v41 = vmul.f32 1.442695, %v3053_v30  ;;  %v3054_v42 = vsub.f32 %v3022_v14, %v3038_v38 }
0x1063   :  { %4652 = vpow2.f32 %v3063_v41  ;;  %v3065_v44 = vmul.f32 1.442695, %v3054_v42 }
0x1065   :  { %v5410_v45 = vpop.eup %4648  ;;  %4654 = vpow2.f32 %v3065_v44 }
0x1066   :  { %v3041_v46 = vpop.xlane.xlu0 %3040  ;;  %v3075_v1 = vsel %vm1212_vm12, %v5410_v45, 0.0 }
0x1067   :  { %v5414_v48 = vpop.eup %4650  ;;  %v3055_v47 = vsub.f32 %v3023_v21, %v3041_v46  ;;  %3076 = vadd.xlane.f32.xlu1 %v3075_v1 }
0x1068   :  { %v3044_v56 = vpop.xlane.xlu1 %3043  ;;  %v3078_v35 = vsel %vm1212_vm12, %v5414_v48, 0.0 }
0x1069   :  { %v3067_v49 = vmul.f32 1.442695, %v3055_v47  ;;  %v3056_v50 = vsub.f32 %v3024_v25, %v3044_v56  ;;  %3079 = vadd.xlane.f32.xlu0 %v3078_v35 }
0x106a   :  { %v3047_v39 = vpop.xlane.xlu0 %3046 }
0x106b   :  { %4656 = vpow2.f32 %v3067_v49  ;;  %v3069_v51 = vmul.f32 1.442695, %v3056_v50  ;;  %v3057_v52 = vsub.f32 %v3025_v12, %v3047_v39 }
0x106c   :  { %v3050_v53 = vpop.xlane.xlu1 %3049 }
0x106d   :  { %v5418_v54 = vpop.eup %4652  ;;  %4658 = vpow2.f32 %v3069_v51  ;;  %v3071_v27 = vmul.f32 1.442695, %v3057_v52  ;;  %v3058_v57 = vsub.f32 %v3026_v7, %v3050_v53 }
0x106e   :  { %v2224_v58 = vpop.permute.xlu0 %2223  ;;  %v3081_v37 = vsel %vm1212_vm12, %v5418_v54, 0.0 }
0x106f   :  { %v5422_v11 = vpop.eup %4654  ;;  %4660 = vpow2.f32 %v3071_v27  ;;  %v3073_v62 = vmul.f32 1.442695, %v3058_v57  ;;  %3082 = vadd.xlane.f32.xlu0 %v3081_v37  ;;  %v2267_v4 = vshrl.u32 %v2224_v58, 16 }
0x1070   :  { %v2226_v63 = vpop.permute.xlu1 %2225  ;;  %v3084_v3 = vsel %vm1212_vm12, %v5422_v11, 0.0 }
0x1071   :  { %4662 = vpow2.f32 %v3073_v62  ;;  %v2265_v40 = vpack.i.b16 %v2226_v63, %v2224_v58  ;;  %v2268_v5 = vshrl.u32 %v2226_v63, 16  ;;  %3085 = vadd.xlane.f32.xlu1 %v3084_v3 }
0x1072   :  { %v2230_v43 = vpop.permute.xlu0 %2229 }
0x1073   :  { %v2269_v6 = vpack.i.b16 %v2268_v5, %v2267_v4  ;;  %v2311_v14 = vcombine.high %v2265_v40, %v5085_v22  ;;  %v2276_v16 = vshrl.u32 %v2230_v43, 16  ;;  %v2318_v61 = vrot.slane %v2265_v40, %v4944_v20 }
0x1074   :  { %v2228_v8 = vpop.permute.xlu1 %2227 }
0x1075   :  { %v5427_v10 = vpop.eup %4656  ;;  %v2273_v13 = vpack.i.b16 %v2230_v43, %v2228_v8  ;;  %v2445_v15 = vcombine.high %v2269_v6, %v5085_v22  ;;  %v2275_v17 = vshrl.u32 %v2228_v8, 16  ;;  %v2325_v25 = vrot.slane %v2311_v14, %v4944_v20 }
0x1076   :  { %v3087_v19 = vsel %vm1212_vm12, %v5427_v10, 0.0  ;;  %v2452_v9 = vrot.slane %v2269_v6, %v4944_v20 }
0x1077   :  { %v5432_v36 = vpop.eup %4658  ;;  %v2326_v21 = vcombine.high %v2273_v13, %v5085_v22  ;;  %v2333_v23 = vrot.slane %v2273_v13, %v4944_v20  ;;  %3088 = vadd.xlane.f32.xlu0 %v3087_v19  ;;  %v2277_v12 = vpack.i.b16 %v2276_v16, %v2275_v17  ;;  %v2459_v31 = vrot.slane %v2445_v15, %v4944_v20 }
0x1078   :  { %v3090_v28 = vsel %vm1212_vm12, %v5432_v36, 0.0 }
0x1079   :  { %v5440_v7 = vpop.eup %4660  ;;  %v2340_v29 = vrot.slane %v2326_v21, %v4944_v20  ;;  %v2373_v60 = vcombine.low %v2318_v61, %v2333_v23  ;;  %v2374_v0 = vcombine.high %v2318_v61, %v2333_v23  ;;  %3091 = vadd.xlane.f32.xlu1 %v3090_v28  ;;  %v2460_v32 = vcombine.high %v2277_v12, %v5085_v22 }
0x107a   :  { %v2467_v33 = vrot.slane %v2277_v12, %v4944_v20  ;;  %v3093_v34 = vsel %vm1212_vm12, %v5440_v7, 0.0 }
0x107b   :  { %v5449_v24 = vpop.eup %4662  ;;  %v2381_v30 = vrot.slane %v2373_v60, %v4948_v26  ;;  %v2388_v38 = vrot.slane %v2374_v0, %v4948_v26  ;;  %v2389_v41 = vcombine.low %v2325_v25, %v2340_v29  ;;  %v2390_v42 = vcombine.high %v2325_v25, %v2340_v29  ;;  %3094 = vadd.xlane.f32.xlu0 %v3093_v34 }
0x107c   :  { %v2474_v44 = vrot.slane %v2460_v32, %v4944_v20  ;;  %v2507_v46 = vcombine.low %v2452_v9, %v2467_v33  ;;  %v2508_v1 = vcombine.high %v2452_v9, %v2467_v33  ;;  %v3096_v22 = vsel %vm1212_vm12, %v5449_v24, 0.0 }
0x107d   :  { %v2397_v47 = vrot.slane %v2389_v41, %v4948_v26  ;;  %v2404_v56 = vrot.slane %v2390_v42, %v4948_v26  ;;  %v4129_v35 = vcombine.low %v2381_v30, %v2388_v38  ;;  %v4131_v49 = vcombine.high %v2381_v30, %v2388_v38  ;;  %3097 = vadd.xlane.f32.xlu1 %v3096_v22 }
0x107e   :  { %v2515_v50 = vrot.slane %v2507_v46, %v4948_v26  ;;  %v2522_v39 = vrot.slane %v2508_v1, %v4948_v26  ;;  %v2523_v51 = vcombine.low %v2459_v31, %v2474_v44  ;;  %v2524_v52 = vcombine.high %v2459_v31, %v2474_v44 }
0x107f   :  { %v2562_v53 = vrot.slane %v4129_v35, %v4944_v20  ;;  %v2578_v27 = vrot.slane %v4131_v49, %v4944_v20  ;;  %v4133_v57 = vcombine.low %v2397_v47, %v2404_v56  ;;  %v4135_v58 = vcombine.high %v2397_v47, %v2404_v56 }
0x1080   :  { %v2531_v37 = vrot.slane %v2523_v51, %v4948_v26  ;;  %v2538_v62 = vrot.slane %v2524_v52, %v4948_v26  ;;  %v4137_v63 = vcombine.low %v2515_v50, %v2522_v39  ;;  %v4139_v3 = vcombine.high %v2515_v50, %v2522_v39 }
0x1081   :  { %v2594_v4 = vrot.slane %v4133_v57, %v4944_v20  ;;  %v2610_v40 = vrot.slane %v4135_v58, %v4944_v20  ;;  %v2627_v5 = vcombine.low %v2562_v53, %v2578_v27 }
0x1082   :  { %v2680_v6 = vrot.slane %v4137_v63, %v4944_v20  ;;  %v2696_v43 = vrot.slane %v4139_v3, %v4944_v20  ;;  %v4141_v14 = vcombine.low %v2531_v37, %v2538_v62  ;;  %v4143_v8 = vcombine.high %v2531_v37, %v2538_v62 }
0x1083   :  { %v2651_v13 = vcombine.low %v2594_v4, %v2610_v40  ;;  %v2634_v19 = vrot.slane %v2627_v5, %v4948_v26 }
0x1084   :  { %v2712_v15 = vrot.slane %v4141_v14, %v4944_v20  ;;  %v2728_v16 = vrot.slane %v4143_v8, %v4944_v20  ;;  %v2745_v17 = vcombine.low %v2680_v6, %v2696_v43 }
0x1085   :  { %v2658_v61 = vrot.slane %v2651_v13, %v4948_v26 }
0x1086   :  { %v2769_v21 = vcombine.low %v2712_v15, %v2728_v16  ;;  %v2752_v12 = vrot.slane %v2745_v17, %v4948_v26 }
0x1087   :  { %v2663_v23 = vcombine.low %v2634_v19, %v2658_v61  ;;  %v2664_v25 = vcombine.high %v2634_v19, %v2658_v61 }
0x1088   :  { %v2776_v28 = vrot.slane %v2769_v21, %v4948_v26 }
0x1089   :  { %v2811_v60 = vshrl.u32 %v2663_v23, 16  ;;  %v2819_v0 = vshrl.u32 %v2664_v25, 16 }
0x108a   :  { %v2781_v9 = vcombine.low %v2752_v12, %v2776_v28  ;;  %v2782_v29 = vcombine.high %v2752_v12, %v2776_v28 }
0x108c   :  { %v2809_v31 = vpack.i.b16 %v2781_v9, %v2663_v23  ;;  %v2812_v32 = vshrl.u32 %v2781_v9, 16  ;;  %v2817_v33 = vpack.i.b16 %v2782_v29, %v2664_v25  ;;  %v2820_v34 = vshrl.u32 %v2782_v29, 16 }
0x108e   :  { %4434 = vmatpush3.bf16.msra.mxu0 %v2809_v31  ;;  %v2813_v30 = vpack.i.b16 %v2812_v32, %v2811_v60  ;;  %v2821_v38 = vpack.i.b16 %v2820_v34, %v2819_v0 }
0x108f   :  { %4445 = vmatprep.subr.bf16.mxu0 %v4717_v2 }
0x1090   :  { %4440 = vmatpush3.bf16.msra.mxu1 %v2813_v30 }
0x1091   :  { %4451 = vmatprep.subr.bf16.mxu1 %v4717_v2 }
0x10f4   :  { %v3077_v41 = vpop.xlane.xlu1 %3076 }
0x10f5   :  { %4664 = vrcp.f32 %v3077_v41 }
0x10f6   :  { %v3080_v42 = vpop.xlane.xlu0 %3079 }
0x10f7   :  { %4666 = vrcp.f32 %v3080_v42 }
0x10fc   :  { %v3083_v44 = vpop.xlane.xlu0 %3082 }
0x10fd   :  { %4668 = vrcp.f32 %v3083_v44 }
0x10fe   :  { %v3086_v46 = vpop.xlane.xlu1 %3085 }
0x10ff   :  { %v4665_v1 = vpop.eup %4664  ;;  %4670 = vrcp.f32 %v3086_v46 }
0x1100   :  { %v3100_v47 = vmul.f32 %v4665_v1, %v5410_v45 }
0x1101   :  { %v4667_v22 = vpop.eup %4666 }
0x1102   :  { %v3102_v56 = vmul.f32 %v4667_v22, %v5414_v48 }
0x1104   :  { %v3089_v35 = vpop.xlane.xlu0 %3088  ;;  %v3115_v49 = vpack.c.bf16 %v3102_v56, %v3100_v47 }
0x1105   :  { %4672 = vrcp.f32 %v3089_v35 }
0x1106   :  { %4436 = vmatmul.mubr.msk.bf16.vlgmr.msra.gmra.mrb[32].mxu0 %vm1212_vm12, %v3115_v49  ;;  %v3092_v50 = vpop.xlane.xlu1 %3091 }
0x1107   :  { %v4669_v39 = vpop.eup %4668  ;;  %4446 = vmatpush3.bf16.msra.mxu0 %v2817_v33  ;;  %4674 = vrcp.f32 %v3092_v50  ;;  %4447 = vmatprep.mubr.msk.bf16.mxu0 %vm4718_vm0, %v4717_v2 }
0x1108   :  { %v3095_v51 = vpop.xlane.xlu0 %3094  ;;  %4457 = vmatprep.subr.bf16.mxu0 %v4717_v2  ;;  %v3104_v45 = vmul.f32 %v4669_v39, %v5418_v54 }
0x1109   :  { %v4671_v52 = vpop.eup %4670  ;;  %4676 = vrcp.f32 %v3095_v51 }
0x110a   :  { %v3106_v48 = vmul.f32 %v4671_v52, %v5422_v11  ;;  %v3098_v53 = vpop.xlane.xlu1 %3097 }
0x110b   :  { %4678 = vrcp.f32 %v3098_v53 }
0x110c   :  { %v3116_v27 = vpack.c.bf16 %v3106_v48, %v3104_v45 }
0x110e   :  { %4442 = vmatmul.mubr.msk.bf16.vlgmr.msra.gmra.mrb[40].mxu1 %vm1212_vm12, %v3116_v27 }
0x110f   :  { %v4673_v57 = vpop.eup %4672  ;;  %4452 = vmatpush3.bf16.msra.mxu1 %v2821_v38  ;;  %4453 = vmatprep.mubr.msk.bf16.mxu1 %vm4718_vm0, %v4717_v2 }
0x1110   :  { %4465 = vmatprep.subr.bf16.mxu1 %v4717_v2  ;;  %v3108_v37 = vmul.f32 %v4673_v57, %v5427_v10 }
0x1111   :  { %v4675_v58 = vpop.eup %4674 }
0x1112   :  { %v3110_v62 = vmul.f32 %v4675_v58, %v5432_v36 }
0x1113   :  { %v4677_v54 = vpop.eup %4676 }
0x1114   :  { %v3117_v63 = vpack.c.bf16 %v3110_v62, %v3108_v37  ;;  %v3112_v3 = vmul.f32 %v4677_v54, %v5440_v7 }
0x1115   :  { %v4679_v11 = vpop.eup %4678 }
0x1116   :  { %v3114_v4 = vmul.f32 %v4679_v11, %v5449_v24  ;;  %4448 = vmatmul.mubr.msk.bf16.vlgmr.msra.gmra.mrb[36].mxu0 %vm1212_vm12, %v3117_v63 }
0x1117   :  { %4461 = vmatprep.mubr.msk.bf16.mxu0 %vm4718_vm0, %v4717_v2 }
0x1118   :  { %v3118_v40 = vpack.c.bf16 %v3114_v4, %v3112_v3  ;;  %v4580_v4 = vld [vmem:[%s5662_s4 + $0x10] sm:$0xff]  }
0x1119   :  { %4458 = vmatpush3.bf16.msra.mxu0 %v4580_v4 }
0x111a   :  { %4454 = vmatmul.mubr.msk.bf16.vlgmr.msra.gmra.mrb[44].mxu1 %vm1212_vm12, %v3118_v40  ;;  %4459 = vmatprep.subr.bf16.mxu0 %v4717_v2 }
0x111b   :  { %4469 = vmatprep.mubr.msk.bf16.mxu1 %vm4718_vm0, %v4717_v2 }
0x11d9   :  { %v3156_v10 = vpop.f32.mrb[32].mxu0 }
0x11da   :  { %v4437_v36 = vpop.f32.mrb[33].mxu0 }
0x11db   :  { %v3159_v5 = vpop.f32.mrb[34].mxu0 }
0x11dc   :  { %v4438_v6 = vpop.f32.mrb[35].mxu0 }
0x11e1   :  { %v3200_v43 = vpop.f32.mrb[40].mxu1 }
0x11e2   :  { %v4443_v14 = vpop.f32.mrb[41].mxu1 }
0x11e3   :  { %v3203_v7 = vpop.f32.mrb[42].mxu1 }
0x11e4   :  { %v4444_v8 = vpop.f32.mrb[43].mxu1 }
0x11e9   :  { %v3244_v24 = vpop.f32.mrb[36].mxu0 }
0x11ea   :  { %v3295_v13 = vcombine.low %v3156_v10, %v3244_v24  ;;  %v3296_v15 = vcombine.high %v3156_v10, %v3244_v24  ;;  %v4449_v16 = vpop.f32.mrb[37].mxu0 }
0x11eb   :  { %v3247_v17 = vpop.f32.mrb[38].mxu0 }
0x11ec   :  { %v3363_v19 = vcombine.low %v3159_v5, %v3247_v17  ;;  %v3364_v61 = vcombine.high %v3159_v5, %v3247_v17  ;;  %v4450_v21 = vpop.f32.mrb[39].mxu0  ;;  %v3303_v9 = vrot.slane %v3295_v13, %v4944_v20  ;;  %v3310_v29 = vrot.slane %v3296_v15, %v4944_v20 }
0x11ed   :  { %v3288_v23 = vpop.f32.mrb[44].mxu1  ;;  %v4581_v21 = vld [vmem:[%s5662_s4 + $0x18] sm:$0xff]   ;;  %s5697_s4 = smov 16  }
0x11ee   :  { %v3311_v25 = vcombine.low %v3200_v43, %v3288_v23  ;;  %v3312_v12 = vcombine.high %v3200_v43, %v3288_v23  ;;  %v4455_v28 = vpop.f32.mrb[45].mxu1  ;;  %v3371_v44 = vrot.slane %v3363_v19, %v4944_v20  ;;  %v3378_v46 = vrot.slane %v3364_v61, %v4944_v20  ;;  %4460 = vmatpush3.bf16.msra.mxu0 %v4581_v21 }
0x11ef   :  { %v3291_v60 = vpop.f32.mrb[46].mxu1  ;;  %4473 = vmatprep.subr.bf16.mxu0 %v4717_v2 }
0x11f0   :  { %v3319_v0 = vrot.slane %v3311_v25, %v4944_v20  ;;  %v3326_v31 = vrot.slane %v3312_v12, %v4944_v20  ;;  %v3379_v32 = vcombine.low %v3203_v7, %v3291_v60  ;;  %v3380_v33 = vcombine.high %v3203_v7, %v3291_v60  ;;  %v4456_v34 = vpop.f32.mrb[47].mxu1 }
0x11f2   :  { %v3327_v30 = vcombine.low %v3303_v9, %v3319_v0  ;;  %v3328_v38 = vcombine.high %v3303_v9, %v3319_v0  ;;  %v3343_v41 = vcombine.low %v3310_v29, %v3326_v31  ;;  %v3344_v42 = vcombine.high %v3310_v29, %v3326_v31 }
0x11f3   :  { %v3387_v1 = vrot.slane %v3379_v32, %v4944_v20  ;;  %v3394_v22 = vrot.slane %v3380_v33, %v4944_v20 }
0x11f4   :  { %v3335_v47 = vrot.slane %v3327_v30, %v4948_v26  ;;  %v3342_v56 = vrot.slane %v3328_v38, %v4948_v26  ;;  %v3351_v35 = vrot.slane %v3343_v41, %v4948_v26  ;;  %v3358_v49 = vrot.slane %v3344_v42, %v4948_v26 }
0x11f5   :  { %v3395_v50 = vcombine.low %v3371_v44, %v3387_v1  ;;  %v3396_v39 = vcombine.high %v3371_v44, %v3387_v1  ;;  %v3411_v51 = vcombine.low %v3378_v46, %v3394_v22  ;;  %v3412_v52 = vcombine.high %v3378_v46, %v3394_v22 }
0x11f6   :  { %v3431_v45 = vcombine.low %v3335_v47, %v3342_v56  ;;  %v4152_v48 = vcombine.high %v3335_v47, %v3342_v56  ;;  %v3447_v53 = vcombine.low %v3351_v35, %v3358_v49  ;;  %v4153_v27 = vcombine.high %v3351_v35, %v3358_v49 }
0x11f7   :  { %v3403_v57 = vrot.slane %v3395_v50, %v4948_v26  ;;  %v3410_v58 = vrot.slane %v3396_v39, %v4948_v26  ;;  %v3419_v37 = vrot.slane %v3411_v51, %v4948_v26  ;;  %v3426_v62 = vrot.slane %v3412_v52, %v4948_v26 }
0x11f8   :  { %v3438_v54 = vrot.slane %v3431_v45, %v4944_v20  ;;  %v3446_v63 = vrot.slane %v4152_v48, %v4944_v20  ;;  %v3454_v11 = vrot.slane %v3447_v53, %v4944_v20  ;;  %v3462_v3 = vrot.slane %v4153_v27, %v4944_v20 }
0x11f9   :  { %v3499_v40 = vcombine.low %v3403_v57, %v3410_v58  ;;  %v4154_v10 = vcombine.high %v3403_v57, %v3410_v58  ;;  %v3515_v36 = vcombine.low %v3419_v37, %v3426_v62  ;;  %v4155_v5 = vcombine.high %v3419_v37, %v3426_v62  ;;  %v4161_v58 = vld [vmem:[%s5663_s5 + $0x1] ss:$0 sm:$0xff] }
0x11fa   :  { %v3464_v6 = vcombine.high %v3438_v54, %v3446_v63  ;;  %v3480_v43 = vcombine.high %v3454_v11, %v3462_v3  ;;  %v3463_v14 = vcombine.low %v3438_v54, %v3446_v63  ;;  %v3479_v7 = vcombine.low %v3454_v11, %v3462_v3 }
0x11fb   :  { %v3506_v8 = vrot.slane %v3499_v40, %v4944_v20  ;;  %v3514_v24 = vrot.slane %v4154_v10, %v4944_v20  ;;  %v3522_v13 = vrot.slane %v3515_v36, %v4944_v20  ;;  %v3530_v15 = vrot.slane %v4155_v5, %v4944_v20 }
0x11fc   :  { %v3478_v16 = vrot.slane %v3464_v6, %v4948_v26  ;;  %v3494_v17 = vrot.slane %v3480_v43, %v4948_v26  ;;  %v3471_v19 = vrot.slane %v3463_v14, %v4948_v26  ;;  %v3487_v61 = vrot.slane %v3479_v7, %v4948_v26 }
0x11fd   :  { %v3532_v23 = vcombine.high %v3506_v8, %v3514_v24  ;;  %v3548_v25 = vcombine.high %v3522_v13, %v3530_v15  ;;  %v3531_v12 = vcombine.low %v3506_v8, %v3514_v24  ;;  %v3547_v28 = vcombine.low %v3522_v13, %v3530_v15  ;;  %v4582_v15 = vld [vmem:[%s5664_s6 + $0x10] sm:$0xff]  }
0x11fe   :  { %v3497_v9 = vcombine.low %v3478_v16, %v3494_v17  ;;  %v3495_v20 = vcombine.low %v3471_v19, %v3487_v61  ;;  %v3496_v29 = vcombine.high %v3471_v19, %v3487_v61  ;;  %v3498_v60 = vcombine.high %v3478_v16, %v3494_v17  ;;  %4466 = vmatpush3.bf16.msra.mxu1 %v4582_v15  ;;  %v4583_v16 = vld [vmem:[%s5664_s6 + $0x18] sm:$0xff]  }
0x11ff   :  { %v3546_v0 = vrot.slane %v3532_v23, %v4948_v26  ;;  %v3562_v31 = vrot.slane %v3548_v25, %v4948_v26  ;;  %v3539_v32 = vrot.slane %v3531_v12, %v4948_v26  ;;  %v3555_v33 = vrot.slane %v3547_v28, %v4948_v26  ;;  %4467 = vmatprep.subr.bf16.mxu1 %v4717_v2 }
0x1201   :  { %v3565_v34 = vcombine.low %v3546_v0, %v3562_v31  ;;  %v3564_v30 = vcombine.high %v3539_v32, %v3555_v33  ;;  %v3563_v38 = vcombine.low %v3539_v32, %v3555_v33  ;;  %v3566_v41 = vcombine.high %v3546_v0, %v3562_v31  ;;  %v4168_v0 = vld [vmem:[%s5671_s13 + $0x1] ss:$0 sm:$0xff] }
0x1202   :  { %4468 = vmatpush3.bf16.msra.mxu1 %v4583_v16 }
0x1203   :  { %v4546_v42 = vpack.i.bf16 %v3565_v34, %v3497_v9  ;;  %v4541_v44 = vpack.i.bf16 %v3564_v30, %v3496_v29  ;;  %v4551_v46 = vpack.i.bf16 %v3566_v41, %v3498_v60  ;;  %4493 = vmatprep.subr.bf16.mxu1 %v4717_v2  ;;  %v4167_v9 = vld [vmem:[%s5670_s12 + $0x1] ss:$0 sm:$0xff]  ;;  %v4586_v41 = vld [vmem:[%s5666_s8 + $0x50] sm:$0xff]  }
0x1204   :  { %v4584_v30 = vld [vmem:[%s5666_s8 + $0x40] sm:$0xff]  }
0x1205   :  { %4547 = vrot.lane.b32.xlu1 %v4546_v42, %s5697_s4  ;;  %4542 = vrot.lane.b32.xlu0 %v4541_v44, %s5698_s22  ;;  %v4587_v42 = vld [vmem:[%s5666_s8 + $0x58] sm:$0xff]   ;;  %v4588_v44 = vld [vmem:[%s5666_s8 + $0x60] sm:$0xff]  }
0x1209   :  { %4552 = vrot.lane.b32.xlu1 %v4551_v46, %s5699_s27  ;;  %v4589_v46 = vld [vmem:[%s5666_s8 + $0x68] sm:$0xff]  }
0x1277   :  { %v4548_v1 = vpop.permute.xlu1 %4547  ;;  %v4543_v22 = vpop.permute.xlu0 %4542 }
0x1278   :  { %v4545_v47 = vunpack.i.h.bf16 %v4543_v22  ;;  %v4544_v56 = vunpack.i.l.bf16 %v4543_v22  ;;  %v4550_v26 = vunpack.i.h.bf16 %v4548_v1  ;;  %v4549_v35 = vunpack.i.l.bf16 %v4548_v1  ;;  %v4590_v1 = vld [vmem:[%s5666_s8 + $0x70] sm:$0xff]   ;;  %v4591_v22 = vld [vmem:[%s5666_s8 + $0x78] sm:$0xff]  }
0x127a   :  { %v3591_v49 = vsel %vm248_vm5, %v3495_v20, %v4544_v56  ;;  %v3592_v50 = vsel %vm248_vm5, %v3563_v38, %v4545_v47  ;;  %v4585_v38 = vld [vmem:[%s5666_s8 + $0x48] sm:$0xff]   ;;  %v4174_v47 = vld [vmem:[%s5665_s7 + $0x1] ss:$0 sm:$0xff] }
0x127b   :  { %v4553_v39 = vpop.permute.xlu1 %4552  ;;  %v3593_v45 = vsel %vm1212_vm12, %v3591_v49, %v4549_v35  ;;  %v3594_v48 = vsel %vm1212_vm12, %v3592_v50, %v4550_v26 }
0x127c   :  { %v4555_v51 = vunpack.i.h.bf16 %v4553_v39  ;;  %v4554_v52 = vunpack.i.l.bf16 %v4553_v39 }
0x127e   :  { %v3595_v53 = vsel %vm1781_vm13, %v3593_v45, %v4554_v52  ;;  %v3596_v27 = vsel %vm1781_vm13, %v3594_v48, %v4555_v51 }
0x127f   :  { %v3597_v57 = vpack.c.bf16 %v3596_v27, %v3595_v53 }
0x1281   :  { %4462 = vmatmul.mubr.msk.bf16.vlgmr.msra.gmra.mrb[40].mxu0 %vm185_vm4, %v3597_v57 }
0x1282   :  { %4489 = vmatprep.mubr.msk.bf16.mxu0 %vm4718_vm0, %v4717_v2  ;;  %4474 = vmatpush3.bf16.msra.mxu0 %v4584_v30 }
0x1283   :  { %4475 = vmatprep.subr.bf16.mxu0 %v4717_v2 }
0x1286   :  { %4476 = vmatpush3.bf16.msra.mxu0 %v4585_v38 }
0x1287   :  { %4477 = vmatprep.subr.bf16.mxu0 %v4717_v2 }
0x128a   :  { %4478 = vmatpush3.bf16.msra.mxu0 %v4586_v41  ;;  %v4204_v41 = vld [vmem:[%s5672_s14] ss:$0 sm:$0xff]  ;;  %s4738_s14 = smov [#allocation2]  }
0x128b   :  { %4479 = vmatprep.subr.bf16.mxu0 %v4717_v2  ;;  %s4042_s13 = sshll.u32 %s4738_s14, 4  ;;  %s4043_s13 = int_to_ptr.vmem [resolvable:$true] %s4042_s13 }
0x128c   :  { %p4697_p1 = scmp.lt.s32.totalorder %s4043_s13, %s4043_s13 }
0x128e   :  { %4480 = vmatpush3.bf16.msra.mxu0 %v4587_v42 }
0x128f   :  { %4481 = vmatprep.subr.bf16.mxu0 %v4717_v2 }
0x1292   :  { %4482 = vmatpush3.bf16.msra.mxu0 %v4588_v44 }
0x1293   :  { %4483 = vmatprep.subr.bf16.mxu0 %v4717_v2 }
0x1296   :  { %4484 = vmatpush3.bf16.msra.mxu0 %v4589_v46 }
0x1297   :  { %4485 = vmatprep.subr.bf16.mxu0 %v4717_v2 }
0x129a   :  { %4486 = vmatpush3.bf16.msra.mxu0 %v4590_v1  ;;  %v4205_v1 = vld [vmem:[%s5673_s15] ss:$0 sm:$0xff]  ;;  %s4692_s15 = scalar_lea.vmem %s4043_s13, 256 }
0x129b   :  { %4487 = vmatprep.subr.bf16.mxu0 %v4717_v2  ;;  %p4693_p0 = scmp.ne.s32.totalorder %s4043_s13, %s4692_s15  ;;  %p4698_p2 = scmp.lt.s32.totalorder %s4692_s15, %s4692_s15 }
0x129d   :  { %p4699_p3 = por %p4698_p2, %p4697_p1 }
0x129e   :  { %4488 = vmatpush3.bf16.msra.mxu0 %v4591_v22 }
0x129f   :  { %p4700_p4 = pnand %p4699_p3, %p4693_p0 }
0x1354   :  { %v3660_v37 = vpop.f32.mrb[40].mxu0 }
0x1355   :  { %v3661_v62 = vadd.f32 %v4161_v58, %v3660_v37  ;;  %v4463_v54 = vpop.f32.mrb[41].mxu0 }
0x1356   :  { %v3663_v63 = vpop.f32.mrb[42].mxu0 }
0x1357   :  { %v5554_v11 = vadd.f32 %v3661_v62, %v5286_v55  ;;  %v3664_v3 = vadd.f32 %v4161_v58, %v3663_v63  ;;  %v4464_v4 = vpop.f32.mrb[43].mxu0 }
0x1359   :  { %v5557_v40 = vadd.f32 %v3664_v3, %v5289_v59  ;;  %v3673_v10 = vsel %vm185_vm4, %v5554_v11, 0.0 }
0x135a   :  { %3674 = vadd.xlane.f32.xlu0 %v3673_v10 }
0x135b   :  { %v3676_v36 = vsel %vm185_vm4, %v5557_v40, 0.0 }
0x135c   :  { %3677 = vadd.xlane.f32.xlu1 %v3676_v36 }
0x13e7   :  { %v3675_v5 = vpop.xlane.xlu0 %3674 }
0x13e8   :  { %v3679_v6 = vmul.f32 0.03125, %v3675_v5 }
0x13e9   :  { %v3678_v43 = vpop.xlane.xlu1 %3677 }
0x13ea   :  { %v3681_v14 = vsub.f32 %v5554_v11, %v3679_v6  ;;  %v3680_v55 = vmul.f32 0.03125, %v3678_v43 }
0x13ec   :  { %v3682_v7 = vsub.f32 %v5557_v40, %v3680_v55  ;;  %v3683_v8 = vmul.f32 %v3681_v14, %v3681_v14 }
0x13ee   :  { %v3685_v59 = vsel %vm185_vm4, %v3683_v8, 0.0  ;;  %v3684_v24 = vmul.f32 %v3682_v7, %v3682_v7 }
0x13ef   :  { %3686 = vadd.xlane.f32.xlu0 %v3685_v59 }
0x13f0   :  { %v3688_v13 = vsel %vm185_vm4, %v3684_v24, 0.0 }
0x13f3   :  { %3689 = vadd.xlane.f32.xlu0 %v3688_v13 }
0x147c   :  { %v3687_v17 = vpop.xlane.xlu0 %3686 }
0x147d   :  { %v3691_v19 = vmul.f32 0.03125, %v3687_v17 }
0x147f   :  { %v3693_v61 = vadd.f32 1e-05, %v3691_v19 }
0x1480   :  { %v3690_v21 = vpop.xlane.xlu0 %3689 }
0x1481   :  { %4680 = vrsqrt.f32 %v3693_v61  ;;  %v3692_v23 = vmul.f32 0.03125, %v3690_v21 }
0x1483   :  { %v3694_v25 = vadd.f32 1e-05, %v3692_v23 }
0x1485   :  { %4682 = vrsqrt.f32 %v3694_v25 }
0x148b   :  { %v4681_v12 = vpop.eup %4680 }
0x148c   :  { %v3697_v28 = vmul.f32 %v4681_v12, %v3681_v14  ;;  %v4195_v14 = vld [vmem:[%s5667_s9 + $0x1] ss:$0 sm:$0xff] }
0x148e   :  { %v3705_v29 = vmul.f32 %v4167_v9, %v3697_v28 }
0x148f   :  { %v4683_v20 = vpop.eup %4682 }
0x1490   :  { %v3698_v60 = vmul.f32 %v4683_v20, %v3682_v7  ;;  %v3713_v32 = vadd.f32 %v4168_v0, %v3705_v29 }
0x1492   :  { %v3706_v31 = vmul.f32 %v4167_v9, %v3698_v60  ;;  %v4593_v60 = vld [vmem:[%s5674_s16 + $0x8] sm:$0xff]  }
0x1494   :  { %v3714_v33 = vadd.f32 %v4168_v0, %v3706_v31 }
0x1496   :  { %v3715_v34 = vpack.c.bf16 %v3714_v33, %v3713_v32 }
0x1498   :  { %4470 = vmatmul.mubr.msk.bf16.vlgmr.msra.gmra.mrb[48].mxu1 %vm185_vm4, %v3715_v34 }
0x1499   :  { %4497 = vmatprep.mubr.msk.bf16.mxu1 %vm4718_vm0, %v4717_v2 }
0x156b   :  { %v3778_v56 = vpop.f32.mrb[48].mxu1 }
0x156c   :  { %v3779_v26 = vadd.f32 %v4174_v47, %v3778_v56  ;;  %v4471_v35 = vpop.f32.mrb[49].mxu1 }
0x156d   :  { %v3781_v49 = vpop.f32.mrb[50].mxu1  ;;  %v4025_v35 = vld [vmem:[%s5675_s17] sm:$0x1] }
0x156e   :  { %v3787_v50 = vmul.f32 0.044715, %v3779_v26  ;;  %v3782_v39 = vadd.f32 %v4174_v47, %v3781_v49  ;;  %v4472_v51 = vpop.f32.mrb[51].mxu1  ;;  %v3785_v4 = vmul.f32 0.5, %v3779_v26  ;;  %v4026_v49 = vmul.f32 5.656854, %v4025_v35 }
0x1570   :  { %v3789_v52 = vmul.f32 %v3787_v50, %v3779_v26  ;;  %v3788_v45 = vmul.f32 0.044715, %v3782_v39  ;;  %v3786_v10 = vmul.f32 0.5, %v3782_v39  ;;  %v4030_v50 = vsub.s32 0, %v4939_v18 }
0x1572   :  { %v3791_v48 = vmul.f32 %v3789_v52, %v3779_v26  ;;  %v3790_v53 = vmul.f32 %v3788_v45, %v3782_v39 }
0x1574   :  { %v3793_v27 = vadd.f32 %v3791_v48, %v3779_v26  ;;  %v3792_v57 = vmul.f32 %v3790_v53, %v3782_v39 }
0x1576   :  { %v3795_v58 = vmul.f32 0.7978846, %v3793_v27  ;;  %v3794_v37 = vadd.f32 %v3792_v57, %v3782_v39  ;;  %v4031_v39 = vrot.slane %v4026_v49, %v4030_v50 }
0x1578   :  { %4684 = vtanh.f32 %v3795_v58  ;;  %v3796_v62 = vmul.f32 0.7978846, %v3794_v37 }
0x157a   :  { %4686 = vtanh.f32 %v3796_v62 }
0x1582   :  { %v4685_v54 = vpop.eup %4684 }
0x1583   :  { %v3799_v63 = vadd.f32 1.0, %v4685_v54 }
0x1584   :  { %v4687_v3 = vpop.eup %4686 }
0x1585   :  { %v3800_v36 = vadd.f32 1.0, %v4687_v3  ;;  %v3801_v5 = vmul.f32 %v3799_v63, %v3785_v4 }
0x1587   :  { %v3802_v6 = vmul.f32 %v3800_v36, %v3786_v10 }
0x1589   :  { %v3803_v43 = vpack.c.bf16 %v3802_v6, %v3801_v5 }
0x158b   :  { %4490 = vmatmul.mubr.bf16.vlgmr.msra.gmra.mrb[44].mxu0 %v3803_v43 }
0x165e   :  { %v3911_v55 = vpop.f32.mrb[44].mxu0 }
0x165f   :  { %v3912_v7 = vadd.f32 %v4195_v14, %v3911_v55  ;;  %v4491_v8 = vpop.f32.mrb[45].mxu0 }
0x1660   :  { %v3914_v59 = vpop.f32.mrb[46].mxu0 }
0x1661   :  { %v3915_v24 = vadd.f32 %v4195_v14, %v3914_v59  ;;  %v4492_v13 = vpop.f32.mrb[47].mxu0  ;;  %v3918_v15 = vadd.f32 %v3912_v7, %v5554_v11 }
0x1663   :  { %v3922_v16 = vsel %vm185_vm4, %v3918_v15, 0.0  ;;  %v3919_v17 = vadd.f32 %v3915_v24, %v5557_v40  ;;  %v4592_v40 = vld [vmem:[%s5674_s16] sm:$0xff]  }
0x1664   :  { %3923 = vadd.xlane.f32.xlu1 %v3922_v16  ;;  %4494 = vmatpush3.bf16.msra.mxu1 %v4592_v40 }
0x1665   :  { %v3925_v19 = vsel %vm185_vm4, %v3919_v17, 0.0  ;;  %4495 = vmatprep.subr.bf16.mxu1 %v4717_v2 }
0x1666   :  { %3926 = vadd.xlane.f32.xlu0 %v3925_v19 }
0x1668   :  { %4496 = vmatpush3.bf16.msra.mxu1 %v4593_v60 }
0x16f1   :  { %v3924_v61 = vpop.xlane.xlu1 %3923 }
0x16f2   :  { %v3928_v21 = vmul.f32 0.03125, %v3924_v61 }
0x16f3   :  { %v3927_v23 = vpop.xlane.xlu0 %3926 }
0x16f4   :  { %v3930_v25 = vsub.f32 %v3918_v15, %v3928_v21  ;;  %v3929_v12 = vmul.f32 0.03125, %v3927_v23 }
0x16f6   :  { %v3931_v28 = vsub.f32 %v3919_v17, %v3929_v12  ;;  %v3932_v9 = vmul.f32 %v3930_v25, %v3930_v25 }
0x16f8   :  { %v3934_v20 = vsel %vm185_vm4, %v3932_v9, 0.0  ;;  %v3933_v29 = vmul.f32 %v3931_v28, %v3931_v28 }
0x16f9   :  { %3935 = vadd.xlane.f32.xlu1 %v3934_v20 }
0x16fa   :  { %v3937_v11 = vsel %vm185_vm4, %v3933_v29, 0.0 }
0x16fb   :  { %3938 = vadd.xlane.f32.xlu0 %v3937_v11 }
0x1786   :  { %v3936_v0 = vpop.xlane.xlu1 %3935 }
0x1787   :  { %v3940_v31 = vmul.f32 0.03125, %v3936_v0 }
0x1788   :  { %v3939_v32 = vpop.xlane.xlu0 %3938 }
0x1789   :  { %v3942_v33 = vadd.f32 1e-05, %v3940_v31  ;;  %v3941_v34 = vmul.f32 0.03125, %v3939_v32 }
0x178b   :  { %4688 = vrsqrt.f32 %v3942_v33  ;;  %v3943_v30 = vadd.f32 1e-05, %v3941_v34 }
0x178d   :  { %4690 = vrsqrt.f32 %v3943_v30 }
0x1795   :  { %v4689_v38 = vpop.eup %4688 }
0x1796   :  { %v3946_v42 = vmul.f32 %v4689_v38, %v3930_v25 }
0x1797   :  { %v4691_v2 = vpop.eup %4690 }
0x1798   :  { %v3954_v44 = vmul.f32 %v4204_v41, %v3946_v42  ;;  %v3947_v46 = vmul.f32 %v4691_v2, %v3931_v28 }
0x179a   :  { %v3955_v22 = vmul.f32 %v4204_v41, %v3947_v46  ;;  %v3962_v47 = vadd.f32 %v4205_v1, %v3954_v44 }
0x179c   :  { %v3963_v56 = vadd.f32 %v4205_v1, %v3955_v22 }
0x179e   :  { %v3964_v26 = vpack.c.bf16 %v3963_v56, %v3962_v47 }
0x17a0   :  { %4498 = vmatmul.mubr.msk.bf16.vlgmr.msra.gmra.mrb[52].mxu1 %vm185_vm4, %v3964_v26 }
0x1873   :  { %v4018_v51 = vpop.f32.mrb[52].mxu1 }
0x1874   :  { %v4033_v52 = vmul.f32 %v4031_v39, %v4018_v51  ;;  %v4499_v45 = vpop.f32.mrb[53].mxu1 }
0x1875   :  { %v4021_v48 = vpop.f32.mrb[54].mxu1 }
0x1876   :  { %4035 = vst [vmem:[#allocation2] sm:$0xff] %v4033_v52  ;;  %v4034_v53 = vmul.f32 %v4031_v39, %v4021_v48  ;;  %v4500_v27 = vpop.f32.mrb[55].mxu1 }
0x1878   :  { %4036 = vst [vmem:[#allocation2 + $0x8] sm:$0xff] %v4034_v53 }
0x1879   :  { %4703 = shalt.err (!%p4700_p4)
}
0x187a   :  { %s4704_s1 = scalar_lea.hbm %s5676_s18, 256 }
0x187b   :  { %p4705_p5 = scmp.ne.s32.totalorder %s5676_s18, %s4704_s1  ;;  %p4708_p6 = scmp.lt.u32.totalorder %s4704_s1, %s5676_s18 }
0x187d   :  { %p4710_p7 = pnand %p4708_p6, %p4705_p5 }
0x187f   :  { %4713 = shalt.err (!%p4710_p7)
}
0x1880   :  { %s4739_s27 = smov 128  }
0x1881   :  { %4048 = dma.vmem_to_hbm [thread:$0]  %s4043_s13, 256, %s5676_s18, [#allocation3], %s4739_s27, %s4739_s27, %s5698_s22  }
0x1882   :  { %4714 = dma.done.wait [#allocation3], 256  }
0x1883   :  { %4715 = vsyncadd [#allocation3], 4294967040 }
0x1884   :  { %4052 = vsyncpa [#allocation3], 1 }

</bundles_post_ra>
